<compile_context>
chip_gen: v5e
topology: v5e:2x2
jax: 0.10.0
libtpu: 0.0.40
codegen_flags: <defaults>
</compile_context>

<pallas_src>
import functools

import jax
import jax.numpy as jnp
from jax.experimental import pallas as pl
from jax.experimental.pallas import tpu as pltpu

_H_CHUNK = 8  # sublane-sized H chunk for the additive-feature accumulation


def _additive_attn_kernel(vl_ref,                 # (Bt, 1, 1) int32  (VMEM)
                          q_ref, k_ref, v_ref,    # (Bt,Q,Dq) (Bt,K,Dk) (Bt,K,Dv) f32
                          wq_ref, wk_ref,         # (Dq,H) (Dk,H) f32
                          wv_ref,                 # (H,) f32 in SMEM (scalar table)
                          o_ref,                  # (Bt, Q, Dv) f32
                          *, feat_dtype):
    bt, qn, dq = q_ref.shape
    _, kn, dk = k_ref.shape
    h = wq_ref.shape[1]

    # ---- linear projections on the MXU: bf16 operands (cast in-kernel), f32 acc ----
    qp = jnp.dot(q_ref[...].reshape(bt * qn, dq).astype(jnp.bfloat16),
                 wq_ref[...].astype(jnp.bfloat16),
                 preferred_element_type=jnp.float32).reshape(bt, qn, h)   # (Bt,Q,H)
    kp = jnp.dot(k_ref[...].reshape(bt * kn, dk).astype(jnp.bfloat16),
                 wk_ref[...].astype(jnp.bfloat16),
                 preferred_element_type=jnp.float32).reshape(bt, kn, h)   # (Bt,K,H)

    # Small transposed copies (Bt*(Q+K)*H) so every H chunk is a cheap sublane slice.
    qpT = jnp.transpose(qp, (0, 2, 1)).astype(feat_dtype)   # (Bt, H, Q)
    kpT = jnp.transpose(kp, (0, 2, 1)).astype(feat_dtype)   # (Bt, H, K)  K on lanes

    # ---- H-chunked additive scores: never materialize (Bt, Q, H, K) ----
    scores = jnp.zeros((bt, qn, kn), dtype=jnp.float32)      # (Bt, Q, K) accumulator
    for h0 in range(0, h, _H_CHUNK):
        hc = min(_H_CHUNK, h - h0)
        qc = qpT[:, h0:h0 + hc, :]                            # (Bt, hc, Q)
        kc = kpT[:, h0:h0 + hc, :]                            # (Bt, hc, K)
        # (Bt, hc, Q, K): K on lanes, Q on sublanes, hc a major axis.
        feat = jnp.tanh(qc[:, :, :, None] + kc[:, :, None, :])
        for i in range(hc):
            # wv scalar straight from SMEM -> no broadcast_in_dim temp.
            scores = scores + wv_ref[h0 + i] * feat[:, i].astype(jnp.float32)

    # ---- masked softmax over K (fill value -1e6, as in d2l.sequence_mask) ----
    kidx = jax.lax.broadcasted_iota(jnp.int32, scores.shape, 2)
    scores = jnp.where(kidx < vl_ref[...], scores, jnp.float32(-1e6))
    m = jnp.max(scores, axis=-1, keepdims=True)
    e = jnp.exp(scores - m)
    p = e * pl.reciprocal(jnp.sum(e, axis=-1, keepdims=True), approx=True)

    # dropout(p) == p in eval mode; output = bmm(attention_weights, values)
    # TODO(synk): training-mode dropout is not implemented (eval-mode identity).
    out = jnp.einsum("bqk,bkv->bqv",
                     p.astype(jnp.bfloat16),
                     v_ref[...].astype(jnp.bfloat16),
                     preferred_element_type=jnp.float32)      # (Bt, Q, Dv) f32
    o_ref[...] = out.astype(o_ref.dtype)


def _device_kind():
    try:
        return jax.devices()[0].device_kind.lower()
    except Exception:
        return ""


def _num_tensorcores(kind):
    # Only v7x has 2 TensorCores per chip; v5e/v6e have 1.
    return 2 if "v7" in kind else 1


def _feature_dtype(kind):
    # bf16 VPU/EUP exist on v6e/v7x; v5e (and unknown) keeps the tanh path in f32.
    if ("v6" in kind) or ("v7" in kind):
        return jnp.bfloat16
    return jnp.float32


def _pick_block_batch(B, Q, K, H, Dq, Dk, Dv, num_tensorcores,
                      vmem_budget_bytes=8 * 1024 * 1024):
    """Largest divisor Bt of B s.t. the per-step working set stays under the
    budget, Bt*Q targets ~512 MXU rows, and (on 2-TC chips only) the grid
    keeps >= num_tensorcores steps."""
    per_batch = 4 * (2 * (Q * Dq + K * Dk + K * Dv)   # double-buffered input blocks
                     + 4 * (Q + K) * H                # qp/kp + transposed copies
                     + 3 * _H_CHUNK * Q * K           # chunk-sized feature temps
                     + 2 * Q * K                      # scores accumulator + mask temp
                     + 2 * Q * Dv)                    # output block (double-buffered)
    max_by_vmem = max(1, vmem_budget_bytes // max(1, per_batch))
    max_by_mxu = max(1, pl.cdiv(512, max(1, Q)))
    if num_tensorcores > 1 and B >= num_tensorcores:
        max_by_grid = max(1, B // num_tensorcores)
    else:
        max_by_grid = B
    target = max(1, min(max_by_vmem, max_by_mxu, max_by_grid))
    bt = 1
    for d in range(1, B + 1):
        if B % d == 0 and d <= target:
            bt = d
    return bt


@jax.jit
def additive_attention(queries, keys, values, valid_lens, w_q, w_k, w_v_col):
    """queries: (B,Q,Dq)  keys: (B,K,Dk)  values: (B,K,Dv)  (float32)
    valid_lens: (B,) int per-batch lengths, or None (no masking)
    w_q: (Dq,H)  w_k: (Dk,H)  w_v_col: (H,1)  (transposed nn.Linear weights)
    """
    B, Q, Dq = queries.shape
    _, K, Dk = keys.shape
    Dv = values.shape[-1]
    H = w_q.shape[1]

    if valid_lens is None:
        valid_lens = jnp.full((B,), K, dtype=jnp.int32)
    # Only 1-D (per-batch) valid_lens supported, not d2l's 2-D per-query form.
    assert valid_lens.ndim == 1, "only 1-D (per-batch) valid_lens supported"
    vl3 = valid_lens.astype(jnp.int32).reshape(B, 1, 1)
    wv_flat = w_v_col.astype(jnp.float32).reshape(H)    # SMEM scalar table

    kind = _device_kind()
    feat_dtype = _feature_dtype(kind)
    Bt = _pick_block_batch(B, Q, K, H, Dq, Dk, Dv,
                           num_tensorcores=_num_tensorcores(kind))
    grid = (B // Bt,)

    grid_spec = pltpu.PrefetchScalarGridSpec(
        num_scalar_prefetch=0,
        grid=grid,
        in_specs=[
            pl.BlockSpec((Bt, 1, 1), lambda b: (b, 0, 0)),        # valid lens
            pl.BlockSpec((Bt, Q, Dq), lambda b: (b, 0, 0)),       # queries (f32)
            pl.BlockSpec((Bt, K, Dk), lambda b: (b, 0, 0)),       # keys    (f32)
            pl.BlockSpec((Bt, K, Dv), lambda b: (b, 0, 0)),       # values  (f32)
            pl.BlockSpec((Dq, H), lambda b: (0, 0)),              # W_q
            pl.BlockSpec((Dk, H), lambda b: (0, 0)),              # W_k
            pl.BlockSpec(memory_space=pltpu.MemorySpace.SMEM),    # w_v scalars
        ],
        out_specs=pl.BlockSpec((Bt, Q, Dv), lambda b: (b, 0, 0)),
    )

    cost = pl.CostEstimate(
        flops=2 * B * H * (Q * Dq + K * Dk) + 4 * B * Q * K * H + 2 * B * Q * K * Dv,
        transcendentals=B * Q * K * (H + 1),
        bytes_accessed=4 * (B * Q * Dq + B * K * Dk + B * K * Dv
                            + Dq * H + Dk * H + H + B + B * Q * Dv),
    )

    kernel = functools.partial(_additive_attn_kernel, feat_dtype=feat_dtype)

    return pl.pallas_call(
        kernel,
        out_shape=jax.ShapeDtypeStruct((B, Q, Dv), jnp.float32),
        grid_spec=grid_spec,
        compiler_params=pltpu.CompilerParams(
            dimension_semantics=("parallel",),
            # Well above our per-step working set; <= physical VMEM on every
            # generation (64 MiB/core on v7x, 128 MiB on v5e/v6e).
            vmem_limit_bytes=32 * 1024 * 1024,
        ),
        cost_estimate=cost,
    )(vl3, queries, keys, values, w_q, w_k, wv_flat)


def _reference(queries, keys, values, valid_lens, w_q, w_k, w_v_col, feat_dtype):
    """Pure-JAX reference mirroring the kernel's numerics
    (bf16 MXU operands, f32 accumulation, feat_dtype add+tanh, f32 softmax)."""
    qp = jnp.einsum("bqd,dh->bqh", queries.astype(jnp.bfloat16),
                    w_q.astype(jnp.bfloat16), preferred_element_type=jnp.float32)
    kp = jnp.einsum("bkd,dh->bkh", keys.astype(jnp.bfloat16),
                    w_k.astype(jnp.bfloat16), preferred_element_type=jnp.float32)
    feat = jnp.tanh(qp.astype(feat_dtype)[:, :, None, :]
                    + kp.astype(feat_dtype)[:, None, :, :])            # (B,Q,K,H)
    scores = jnp.einsum("bqkh,h->bqk", feat.astype(jnp.float32),
                        w_v_col[:, 0].astype(jnp.float32))             # (B,Q,K)
    if valid_lens is not None:
        kidx = jnp.arange(scores.shape[-1])[None, None, :]
        scores = jnp.where(kidx < valid_lens[:, None, None], scores, -1e6)
    attn = jax.nn.softmax(scores, axis=-1)
    return jnp.einsum("bqk,bkv->bqv", attn.astype(jnp.bfloat16),
                      values.astype(jnp.bfloat16),
                      preferred_element_type=jnp.float32)


if __name__ == "__main__":
    # Small shapes consistent with the module's forward signature.
    B, Q, K = 2, 8, 16           # batch, #queries, #key-value pairs
    query_size, key_size = 32, 16
    num_hiddens, value_dim = 32, 32

    key = jax.random.PRNGKey(0)
    kq, kk, kv, kwq, kwk, kwv = jax.random.split(key, 6)

    queries = jax.random.normal(kq, (B, Q, query_size), dtype=jnp.float32)
    keys = jax.random.normal(kk, (B, K, key_size), dtype=jnp.float32)
    values = jax.random.normal(kv, (B, K, value_dim), dtype=jnp.float32)
    valid_lens = jnp.array([3, 11], dtype=jnp.int32)

    # Deterministic parameter init (nn.Linear weights, passed transposed).
    w_q = jax.random.normal(kwq, (query_size, num_hiddens), dtype=jnp.float32) * 0.1
    w_k = jax.random.normal(kwk, (key_size, num_hiddens), dtype=jnp.float32) * 0.1
    w_v_col = jax.random.normal(kwv, (num_hiddens, 1), dtype=jnp.float32) * 0.1

    out = additive_attention(queries, keys, values, valid_lens, w_q, w_k, w_v_col)
    out = jax.block_until_ready(out)

    feat_dtype = _feature_dtype(_device_kind())
    ref = _reference(queries, keys, values, valid_lens, w_q, w_k, w_v_col, feat_dtype)
    assert out.shape == (B, Q, value_dim)
    max_err = float(jnp.max(jnp.abs(out - ref)))
    assert jnp.allclose(out, ref, atol=1e-2, rtol=1e-2), (
        f"mismatch vs reference (max abs err {max_err})")

    print("KERNEL_OK")
</pallas_src>

<mosaic_0001>
module attributes {stable_mosaic.version = 11 : i64} {
  func.func @_additive_attn_kernel(%arg0: i32, %arg1: memref<2x1x1xi32, #tpu.memory_space<vmem>>, %arg2: memref<2x8x32xf32, #tpu.memory_space<vmem>>, %arg3: memref<2x16x16xf32, #tpu.memory_space<vmem>>, %arg4: memref<2x16x32xf32, #tpu.memory_space<vmem>>, %arg5: memref<32x32xf32, #tpu.memory_space<vmem>>, %arg6: memref<16x32xf32, #tpu.memory_space<vmem>>, %arg7: memref<32xf32, #tpu.memory_space<smem>>, %arg8: memref<2x8x32xf32, #tpu.memory_space<vmem>>) attributes {dimension_semantics = [#tpu.dimension_semantics<parallel>], iteration_bounds = array<i64: 1>, scalar_prefetch = 0 : i64, scratch_operands = 0 : i64, tpu.core_type = #tpu.core_type<tc>, window_params = [{transform_indices = @transform_0, window_bounds = array<i64: 2, 1, 1>}, {transform_indices = @transform_1, window_bounds = array<i64: 2, 8, 32>}, {transform_indices = @transform_2, window_bounds = array<i64: 2, 16, 16>}, {transform_indices = @transform_3, window_bounds = array<i64: 2, 16, 32>}, {pipeline_mode = #tpu.pipeline_mode<synchronous>, transform_indices = @transform_4, window_bounds = array<i64: 32, 32>}, {pipeline_mode = #tpu.pipeline_mode<synchronous>, transform_indices = @transform_5, window_bounds = array<i64: 16, 32>}, {transform_indices = @transform_6, window_bounds = array<i64: 32>}, {transform_indices = @transform_7, window_bounds = array<i64: 2, 8, 32>}]} {
    %c0 = arith.constant 0 : index
    %c0_0 = arith.constant 0 : index
    %c0_1 = arith.constant 0 : index
    %0 = vector.load %arg2[%c0, %c0_0, %c0_1] : memref<2x8x32xf32, #tpu.memory_space<vmem>>, vector<2x8x32xf32>
    %1 = vector.shape_cast %0 : vector<2x8x32xf32> to vector<16x32xf32>
    %2 = arith.truncf %1 : vector<16x32xf32> to vector<16x32xbf16>
    %c0_2 = arith.constant 0 : index
    %c0_3 = arith.constant 0 : index
    %3 = vector.load %arg5[%c0_2, %c0_3] : memref<32x32xf32, #tpu.memory_space<vmem>>, vector<32x32xf32>
    %4 = arith.truncf %3 : vector<32x32xf32> to vector<32x32xbf16>
    %cst = arith.constant dense<0.000000e+00> : vector<16x32xf32>
    %5 = tpu.matmul %2, %4, %cst {dimension_numbers = #tpu.dot_dimension_numbers<[1], [0], [0], [1], [0, 0, 1, 1], [], []>} : vector<16x32xbf16>, vector<32x32xbf16>, vector<16x32xf32> -> vector<16x32xf32>
    %6 = vector.shape_cast %5 : vector<16x32xf32> to vector<2x8x32xf32>
    %c0_4 = arith.constant 0 : index
    %c0_5 = arith.constant 0 : index
    %c0_6 = arith.constant 0 : index
    %7 = vector.load %arg3[%c0_4, %c0_5, %c0_6] : memref<2x16x16xf32, #tpu.memory_space<vmem>>, vector<2x16x16xf32>
    %8 = vector.shape_cast %7 : vector<2x16x16xf32> to vector<32x16xf32>
    %9 = arith.truncf %8 : vector<32x16xf32> to vector<32x16xbf16>
    %c0_7 = arith.constant 0 : index
    %c0_8 = arith.constant 0 : index
    %10 = vector.load %arg6[%c0_7, %c0_8] : memref<16x32xf32, #tpu.memory_space<vmem>>, vector<16x32xf32>
    %11 = arith.truncf %10 : vector<16x32xf32> to vector<16x32xbf16>
    %cst_9 = arith.constant dense<0.000000e+00> : vector<32x32xf32>
    %12 = tpu.matmul %9, %11, %cst_9 {dimension_numbers = #tpu.dot_dimension_numbers<[1], [0], [0], [1], [0, 0, 1, 1], [], []>} : vector<32x16xbf16>, vector<16x32xbf16>, vector<32x32xf32> -> vector<32x32xf32>
    %13 = vector.shape_cast %12 : vector<32x32xf32> to vector<2x16x32xf32>
    %14 = tpu.transpose %6, [0, 2, 1] : vector<2x8x32xf32> -> vector<2x32x8xf32>
    %15 = tpu.transpose %13, [0, 2, 1] : vector<2x16x32xf32> -> vector<2x32x16xf32>
    %cst_10 = arith.constant 0.000000e+00 : f32
    %16 = vector.broadcast %cst_10 : f32 to vector<2x8x16xf32>
    %17 = vector.extract_strided_slice %14 {offsets = [0, 0, 0], sizes = [2, 8, 8], strides = [1, 1, 1]} : vector<2x32x8xf32> to vector<2x8x8xf32>
    %18 = vector.extract_strided_slice %15 {offsets = [0, 0, 0], sizes = [2, 8, 16], strides = [1, 1, 1]} : vector<2x32x16xf32> to vector<2x8x16xf32>
    %19 = vector.shape_cast %17 : vector<2x8x8xf32> to vector<2x8x8x1xf32>
    %20 = vector.shape_cast %18 : vector<2x8x16xf32> to vector<2x8x1x16xf32>
    %21 = vector.broadcast %19 : vector<2x8x8x1xf32> to vector<2x8x8x16xf32>
    %22 = vector.broadcast %20 : vector<2x8x1x16xf32> to vector<2x8x8x16xf32>
    %23 = arith.addf %21, %22 : vector<2x8x8x16xf32>
    %24 = math.tanh %23 : vector<2x8x8x16xf32>
    %c0_11 = arith.constant 0 : index
    %25 = memref.load %arg7[%c0_11] : memref<32xf32, #tpu.memory_space<smem>>
    %26 = vector.extract_strided_slice %24 {offsets = [0, 0, 0, 0], sizes = [2, 1, 8, 16], strides = [1, 1, 1, 1]} : vector<2x8x8x16xf32> to vector<2x1x8x16xf32>
    %27 = vector.shape_cast %26 : vector<2x1x8x16xf32> to vector<2x8x16xf32>
    %28 = vector.broadcast %25 : f32 to vector<2x8x16xf32>
    %29 = arith.mulf %28, %27 : vector<2x8x16xf32>
    %30 = arith.addf %16, %29 : vector<2x8x16xf32>
    %c1 = arith.constant 1 : index
    %31 = memref.load %arg7[%c1] : memref<32xf32, #tpu.memory_space<smem>>
    %32 = vector.extract_strided_slice %24 {offsets = [0, 1, 0, 0], sizes = [2, 1, 8, 16], strides = [1, 1, 1, 1]} : vector<2x8x8x16xf32> to vector<2x1x8x16xf32>
    %33 = vector.shape_cast %32 : vector<2x1x8x16xf32> to vector<2x8x16xf32>
    %34 = vector.broadcast %31 : f32 to vector<2x8x16xf32>
    %35 = arith.mulf %34, %33 : vector<2x8x16xf32>
    %36 = arith.addf %30, %35 : vector<2x8x16xf32>
    %c2 = arith.constant 2 : index
    %37 = memref.load %arg7[%c2] : memref<32xf32, #tpu.memory_space<smem>>
    %38 = vector.extract_strided_slice %24 {offsets = [0, 2, 0, 0], sizes = [2, 1, 8, 16], strides = [1, 1, 1, 1]} : vector<2x8x8x16xf32> to vector<2x1x8x16xf32>
    %39 = vector.shape_cast %38 : vector<2x1x8x16xf32> to vector<2x8x16xf32>
    %40 = vector.broadcast %37 : f32 to vector<2x8x16xf32>
    %41 = arith.mulf %40, %39 : vector<2x8x16xf32>
    %42 = arith.addf %36, %41 : vector<2x8x16xf32>
    %c3 = arith.constant 3 : index
    %43 = memref.load %arg7[%c3] : memref<32xf32, #tpu.memory_space<smem>>
    %44 = vector.extract_strided_slice %24 {offsets = [0, 3, 0, 0], sizes = [2, 1, 8, 16], strides = [1, 1, 1, 1]} : vector<2x8x8x16xf32> to vector<2x1x8x16xf32>
    %45 = vector.shape_cast %44 : vector<2x1x8x16xf32> to vector<2x8x16xf32>
    %46 = vector.broadcast %43 : f32 to vector<2x8x16xf32>
    %47 = arith.mulf %46, %45 : vector<2x8x16xf32>
    %48 = arith.addf %42, %47 : vector<2x8x16xf32>
    %c4 = arith.constant 4 : index
    %49 = memref.load %arg7[%c4] : memref<32xf32, #tpu.memory_space<smem>>
    %50 = vector.extract_strided_slice %24 {offsets = [0, 4, 0, 0], sizes = [2, 1, 8, 16], strides = [1, 1, 1, 1]} : vector<2x8x8x16xf32> to vector<2x1x8x16xf32>
    %51 = vector.shape_cast %50 : vector<2x1x8x16xf32> to vector<2x8x16xf32>
    %52 = vector.broadcast %49 : f32 to vector<2x8x16xf32>
    %53 = arith.mulf %52, %51 : vector<2x8x16xf32>
    %54 = arith.addf %48, %53 : vector<2x8x16xf32>
    %c5 = arith.constant 5 : index
    %55 = memref.load %arg7[%c5] : memref<32xf32, #tpu.memory_space<smem>>
    %56 = vector.extract_strided_slice %24 {offsets = [0, 5, 0, 0], sizes = [2, 1, 8, 16], strides = [1, 1, 1, 1]} : vector<2x8x8x16xf32> to vector<2x1x8x16xf32>
    %57 = vector.shape_cast %56 : vector<2x1x8x16xf32> to vector<2x8x16xf32>
    %58 = vector.broadcast %55 : f32 to vector<2x8x16xf32>
    %59 = arith.mulf %58, %57 : vector<2x8x16xf32>
    %60 = arith.addf %54, %59 : vector<2x8x16xf32>
    %c6 = arith.constant 6 : index
    %61 = memref.load %arg7[%c6] : memref<32xf32, #tpu.memory_space<smem>>
    %62 = vector.extract_strided_slice %24 {offsets = [0, 6, 0, 0], sizes = [2, 1, 8, 16], strides = [1, 1, 1, 1]} : vector<2x8x8x16xf32> to vector<2x1x8x16xf32>
    %63 = vector.shape_cast %62 : vector<2x1x8x16xf32> to vector<2x8x16xf32>
    %64 = vector.broadcast %61 : f32 to vector<2x8x16xf32>
    %65 = arith.mulf %64, %63 : vector<2x8x16xf32>
    %66 = arith.addf %60, %65 : vector<2x8x16xf32>
    %c7 = arith.constant 7 : index
    %67 = memref.load %arg7[%c7] : memref<32xf32, #tpu.memory_space<smem>>
    %68 = vector.extract_strided_slice %24 {offsets = [0, 7, 0, 0], sizes = [2, 1, 8, 16], strides = [1, 1, 1, 1]} : vector<2x8x8x16xf32> to vector<2x1x8x16xf32>
    %69 = vector.shape_cast %68 : vector<2x1x8x16xf32> to vector<2x8x16xf32>
    %70 = vector.broadcast %67 : f32 to vector<2x8x16xf32>
    %71 = arith.mulf %70, %69 : vector<2x8x16xf32>
    %72 = arith.addf %66, %71 : vector<2x8x16xf32>
    %73 = vector.extract_strided_slice %14 {offsets = [0, 8, 0], sizes = [2, 8, 8], strides = [1, 1, 1]} : vector<2x32x8xf32> to vector<2x8x8xf32>
    %74 = vector.extract_strided_slice %15 {offsets = [0, 8, 0], sizes = [2, 8, 16], strides = [1, 1, 1]} : vector<2x32x16xf32> to vector<2x8x16xf32>
    %75 = vector.shape_cast %73 : vector<2x8x8xf32> to vector<2x8x8x1xf32>
    %76 = vector.shape_cast %74 : vector<2x8x16xf32> to vector<2x8x1x16xf32>
    %77 = vector.broadcast %75 : vector<2x8x8x1xf32> to vector<2x8x8x16xf32>
    %78 = vector.broadcast %76 : vector<2x8x1x16xf32> to vector<2x8x8x16xf32>
    %79 = arith.addf %77, %78 : vector<2x8x8x16xf32>
    %80 = math.tanh %79 : vector<2x8x8x16xf32>
    %c8 = arith.constant 8 : index
    %81 = memref.load %arg7[%c8] : memref<32xf32, #tpu.memory_space<smem>>
    %82 = vector.extract_strided_slice %80 {offsets = [0, 0, 0, 0], sizes = [2, 1, 8, 16], strides = [1, 1, 1, 1]} : vector<2x8x8x16xf32> to vector<2x1x8x16xf32>
    %83 = vector.shape_cast %82 : vector<2x1x8x16xf32> to vector<2x8x16xf32>
    %84 = vector.broadcast %81 : f32 to vector<2x8x16xf32>
    %85 = arith.mulf %84, %83 : vector<2x8x16xf32>
    %86 = arith.addf %72, %85 : vector<2x8x16xf32>
    %c9 = arith.constant 9 : index
    %87 = memref.load %arg7[%c9] : memref<32xf32, #tpu.memory_space<smem>>
    %88 = vector.extract_strided_slice %80 {offsets = [0, 1, 0, 0], sizes = [2, 1, 8, 16], strides = [1, 1, 1, 1]} : vector<2x8x8x16xf32> to vector<2x1x8x16xf32>
    %89 = vector.shape_cast %88 : vector<2x1x8x16xf32> to vector<2x8x16xf32>
    %90 = vector.broadcast %87 : f32 to vector<2x8x16xf32>
    %91 = arith.mulf %90, %89 : vector<2x8x16xf32>
    %92 = arith.addf %86, %91 : vector<2x8x16xf32>
    %c10 = arith.constant 10 : index
    %93 = memref.load %arg7[%c10] : memref<32xf32, #tpu.memory_space<smem>>
    %94 = vector.extract_strided_slice %80 {offsets = [0, 2, 0, 0], sizes = [2, 1, 8, 16], strides = [1, 1, 1, 1]} : vector<2x8x8x16xf32> to vector<2x1x8x16xf32>
    %95 = vector.shape_cast %94 : vector<2x1x8x16xf32> to vector<2x8x16xf32>
    %96 = vector.broadcast %93 : f32 to vector<2x8x16xf32>
    %97 = arith.mulf %96, %95 : vector<2x8x16xf32>
    %98 = arith.addf %92, %97 : vector<2x8x16xf32>
    %c11 = arith.constant 11 : index
    %99 = memref.load %arg7[%c11] : memref<32xf32, #tpu.memory_space<smem>>
    %100 = vector.extract_strided_slice %80 {offsets = [0, 3, 0, 0], sizes = [2, 1, 8, 16], strides = [1, 1, 1, 1]} : vector<2x8x8x16xf32> to vector<2x1x8x16xf32>
    %101 = vector.shape_cast %100 : vector<2x1x8x16xf32> to vector<2x8x16xf32>
    %102 = vector.broadcast %99 : f32 to vector<2x8x16xf32>
    %103 = arith.mulf %102, %101 : vector<2x8x16xf32>
    %104 = arith.addf %98, %103 : vector<2x8x16xf32>
    %c12 = arith.constant 12 : index
    %105 = memref.load %arg7[%c12] : memref<32xf32, #tpu.memory_space<smem>>
    %106 = vector.extract_strided_slice %80 {offsets = [0, 4, 0, 0], sizes = [2, 1, 8, 16], strides = [1, 1, 1, 1]} : vector<2x8x8x16xf32> to vector<2x1x8x16xf32>
    %107 = vector.shape_cast %106 : vector<2x1x8x16xf32> to vector<2x8x16xf32>
    %108 = vector.broadcast %105 : f32 to vector<2x8x16xf32>
    %109 = arith.mulf %108, %107 : vector<2x8x16xf32>
    %110 = arith.addf %104, %109 : vector<2x8x16xf32>
    %c13 = arith.constant 13 : index
    %111 = memref.load %arg7[%c13] : memref<32xf32, #tpu.memory_space<smem>>
    %112 = vector.extract_strided_slice %80 {offsets = [0, 5, 0, 0], sizes = [2, 1, 8, 16], strides = [1, 1, 1, 1]} : vector<2x8x8x16xf32> to vector<2x1x8x16xf32>
    %113 = vector.shape_cast %112 : vector<2x1x8x16xf32> to vector<2x8x16xf32>
    %114 = vector.broadcast %111 : f32 to vector<2x8x16xf32>
    %115 = arith.mulf %114, %113 : vector<2x8x16xf32>
    %116 = arith.addf %110, %115 : vector<2x8x16xf32>
    %c14 = arith.constant 14 : index
    %117 = memref.load %arg7[%c14] : memref<32xf32, #tpu.memory_space<smem>>
    %118 = vector.extract_strided_slice %80 {offsets = [0, 6, 0, 0], sizes = [2, 1, 8, 16], strides = [1, 1, 1, 1]} : vector<2x8x8x16xf32> to vector<2x1x8x16xf32>
    %119 = vector.shape_cast %118 : vector<2x1x8x16xf32> to vector<2x8x16xf32>
    %120 = vector.broadcast %117 : f32 to vector<2x8x16xf32>
    %121 = arith.mulf %120, %119 : vector<2x8x16xf32>
    %122 = arith.addf %116, %121 : vector<2x8x16xf32>
    %c15 = arith.constant 15 : index
    %123 = memref.load %arg7[%c15] : memref<32xf32, #tpu.memory_space<smem>>
    %124 = vector.extract_strided_slice %80 {offsets = [0, 7, 0, 0], sizes = [2, 1, 8, 16], strides = [1, 1, 1, 1]} : vector<2x8x8x16xf32> to vector<2x1x8x16xf32>
    %125 = vector.shape_cast %124 : vector<2x1x8x16xf32> to vector<2x8x16xf32>
    %126 = vector.broadcast %123 : f32 to vector<2x8x16xf32>
    %127 = arith.mulf %126, %125 : vector<2x8x16xf32>
    %128 = arith.addf %122, %127 : vector<2x8x16xf32>
    %129 = vector.extract_strided_slice %14 {offsets = [0, 16, 0], sizes = [2, 8, 8], strides = [1, 1, 1]} : vector<2x32x8xf32> to vector<2x8x8xf32>
    %130 = vector.extract_strided_slice %15 {offsets = [0, 16, 0], sizes = [2, 8, 16], strides = [1, 1, 1]} : vector<2x32x16xf32> to vector<2x8x16xf32>
    %131 = vector.shape_cast %129 : vector<2x8x8xf32> to vector<2x8x8x1xf32>
    %132 = vector.shape_cast %130 : vector<2x8x16xf32> to vector<2x8x1x16xf32>
    %133 = vector.broadcast %131 : vector<2x8x8x1xf32> to vector<2x8x8x16xf32>
    %134 = vector.broadcast %132 : vector<2x8x1x16xf32> to vector<2x8x8x16xf32>
    %135 = arith.addf %133, %134 : vector<2x8x8x16xf32>
    %136 = math.tanh %135 : vector<2x8x8x16xf32>
    %c16 = arith.constant 16 : index
    %137 = memref.load %arg7[%c16] : memref<32xf32, #tpu.memory_space<smem>>
    %138 = vector.extract_strided_slice %136 {offsets = [0, 0, 0, 0], sizes = [2, 1, 8, 16], strides = [1, 1, 1, 1]} : vector<2x8x8x16xf32> to vector<2x1x8x16xf32>
    %139 = vector.shape_cast %138 : vector<2x1x8x16xf32> to vector<2x8x16xf32>
    %140 = vector.broadcast %137 : f32 to vector<2x8x16xf32>
    %141 = arith.mulf %140, %139 : vector<2x8x16xf32>
    %142 = arith.addf %128, %141 : vector<2x8x16xf32>
    %c17 = arith.constant 17 : index
    %143 = memref.load %arg7[%c17] : memref<32xf32, #tpu.memory_space<smem>>
    %144 = vector.extract_strided_slice %136 {offsets = [0, 1, 0, 0], sizes = [2, 1, 8, 16], strides = [1, 1, 1, 1]} : vector<2x8x8x16xf32> to vector<2x1x8x16xf32>
    %145 = vector.shape_cast %144 : vector<2x1x8x16xf32> to vector<2x8x16xf32>
    %146 = vector.broadcast %143 : f32 to vector<2x8x16xf32>
    %147 = arith.mulf %146, %145 : vector<2x8x16xf32>
    %148 = arith.addf %142, %147 : vector<2x8x16xf32>
    %c18 = arith.constant 18 : index
    %149 = memref.load %arg7[%c18] : memref<32xf32, #tpu.memory_space<smem>>
    %150 = vector.extract_strided_slice %136 {offsets = [0, 2, 0, 0], sizes = [2, 1, 8, 16], strides = [1, 1, 1, 1]} : vector<2x8x8x16xf32> to vector<2x1x8x16xf32>
    %151 = vector.shape_cast %150 : vector<2x1x8x16xf32> to vector<2x8x16xf32>
    %152 = vector.broadcast %149 : f32 to vector<2x8x16xf32>
    %153 = arith.mulf %152, %151 : vector<2x8x16xf32>
    %154 = arith.addf %148, %153 : vector<2x8x16xf32>
    %c19 = arith.constant 19 : index
    %155 = memref.load %arg7[%c19] : memref<32xf32, #tpu.memory_space<smem>>
    %156 = vector.extract_strided_slice %136 {offsets = [0, 3, 0, 0], sizes = [2, 1, 8, 16], strides = [1, 1, 1, 1]} : vector<2x8x8x16xf32> to vector<2x1x8x16xf32>
    %157 = vector.shape_cast %156 : vector<2x1x8x16xf32> to vector<2x8x16xf32>
    %158 = vector.broadcast %155 : f32 to vector<2x8x16xf32>
    %159 = arith.mulf %158, %157 : vector<2x8x16xf32>
    %160 = arith.addf %154, %159 : vector<2x8x16xf32>
    %c20 = arith.constant 20 : index
    %161 = memref.load %arg7[%c20] : memref<32xf32, #tpu.memory_space<smem>>
    %162 = vector.extract_strided_slice %136 {offsets = [0, 4, 0, 0], sizes = [2, 1, 8, 16], strides = [1, 1, 1, 1]} : vector<2x8x8x16xf32> to vector<2x1x8x16xf32>
    %163 = vector.shape_cast %162 : vector<2x1x8x16xf32> to vector<2x8x16xf32>
    %164 = vector.broadcast %161 : f32 to vector<2x8x16xf32>
    %165 = arith.mulf %164, %163 : vector<2x8x16xf32>
    %166 = arith.addf %160, %165 : vector<2x8x16xf32>
    %c21 = arith.constant 21 : index
    %167 = memref.load %arg7[%c21] : memref<32xf32, #tpu.memory_space<smem>>
    %168 = vector.extract_strided_slice %136 {offsets = [0, 5, 0, 0], sizes = [2, 1, 8, 16], strides = [1, 1, 1, 1]} : vector<2x8x8x16xf32> to vector<2x1x8x16xf32>
    %169 = vector.shape_cast %168 : vector<2x1x8x16xf32> to vector<2x8x16xf32>
    %170 = vector.broadcast %167 : f32 to vector<2x8x16xf32>
    %171 = arith.mulf %170, %169 : vector<2x8x16xf32>
    %172 = arith.addf %166, %171 : vector<2x8x16xf32>
    %c22 = arith.constant 22 : index
    %173 = memref.load %arg7[%c22] : memref<32xf32, #tpu.memory_space<smem>>
    %174 = vector.extract_strided_slice %136 {offsets = [0, 6, 0, 0], sizes = [2, 1, 8, 16], strides = [1, 1, 1, 1]} : vector<2x8x8x16xf32> to vector<2x1x8x16xf32>
    %175 = vector.shape_cast %174 : vector<2x1x8x16xf32> to vector<2x8x16xf32>
    %176 = vector.broadcast %173 : f32 to vector<2x8x16xf32>
    %177 = arith.mulf %176, %175 : vector<2x8x16xf32>
    %178 = arith.addf %172, %177 : vector<2x8x16xf32>
    %c23 = arith.constant 23 : index
    %179 = memref.load %arg7[%c23] : memref<32xf32, #tpu.memory_space<smem>>
    %180 = vector.extract_strided_slice %136 {offsets = [0, 7, 0, 0], sizes = [2, 1, 8, 16], strides = [1, 1, 1, 1]} : vector<2x8x8x16xf32> to vector<2x1x8x16xf32>
    %181 = vector.shape_cast %180 : vector<2x1x8x16xf32> to vector<2x8x16xf32>
    %182 = vector.broadcast %179 : f32 to vector<2x8x16xf32>
    %183 = arith.mulf %182, %181 : vector<2x8x16xf32>
    %184 = arith.addf %178, %183 : vector<2x8x16xf32>
    %185 = vector.extract_strided_slice %14 {offsets = [0, 24, 0], sizes = [2, 8, 8], strides = [1, 1, 1]} : vector<2x32x8xf32> to vector<2x8x8xf32>
    %186 = vector.extract_strided_slice %15 {offsets = [0, 24, 0], sizes = [2, 8, 16], strides = [1, 1, 1]} : vector<2x32x16xf32> to vector<2x8x16xf32>
    %187 = vector.shape_cast %185 : vector<2x8x8xf32> to vector<2x8x8x1xf32>
    %188 = vector.shape_cast %186 : vector<2x8x16xf32> to vector<2x8x1x16xf32>
    %189 = vector.broadcast %187 : vector<2x8x8x1xf32> to vector<2x8x8x16xf32>
    %190 = vector.broadcast %188 : vector<2x8x1x16xf32> to vector<2x8x8x16xf32>
    %191 = arith.addf %189, %190 : vector<2x8x8x16xf32>
    %192 = math.tanh %191 : vector<2x8x8x16xf32>
    %c24 = arith.constant 24 : index
    %193 = memref.load %arg7[%c24] : memref<32xf32, #tpu.memory_space<smem>>
    %194 = vector.extract_strided_slice %192 {offsets = [0, 0, 0, 0], sizes = [2, 1, 8, 16], strides = [1, 1, 1, 1]} : vector<2x8x8x16xf32> to vector<2x1x8x16xf32>
    %195 = vector.shape_cast %194 : vector<2x1x8x16xf32> to vector<2x8x16xf32>
    %196 = vector.broadcast %193 : f32 to vector<2x8x16xf32>
    %197 = arith.mulf %196, %195 : vector<2x8x16xf32>
    %198 = arith.addf %184, %197 : vector<2x8x16xf32>
    %c25 = arith.constant 25 : index
    %199 = memref.load %arg7[%c25] : memref<32xf32, #tpu.memory_space<smem>>
    %200 = vector.extract_strided_slice %192 {offsets = [0, 1, 0, 0], sizes = [2, 1, 8, 16], strides = [1, 1, 1, 1]} : vector<2x8x8x16xf32> to vector<2x1x8x16xf32>
    %201 = vector.shape_cast %200 : vector<2x1x8x16xf32> to vector<2x8x16xf32>
    %202 = vector.broadcast %199 : f32 to vector<2x8x16xf32>
    %203 = arith.mulf %202, %201 : vector<2x8x16xf32>
    %204 = arith.addf %198, %203 : vector<2x8x16xf32>
    %c26 = arith.constant 26 : index
    %205 = memref.load %arg7[%c26] : memref<32xf32, #tpu.memory_space<smem>>
    %206 = vector.extract_strided_slice %192 {offsets = [0, 2, 0, 0], sizes = [2, 1, 8, 16], strides = [1, 1, 1, 1]} : vector<2x8x8x16xf32> to vector<2x1x8x16xf32>
    %207 = vector.shape_cast %206 : vector<2x1x8x16xf32> to vector<2x8x16xf32>
    %208 = vector.broadcast %205 : f32 to vector<2x8x16xf32>
    %209 = arith.mulf %208, %207 : vector<2x8x16xf32>
    %210 = arith.addf %204, %209 : vector<2x8x16xf32>
    %c27 = arith.constant 27 : index
    %211 = memref.load %arg7[%c27] : memref<32xf32, #tpu.memory_space<smem>>
    %212 = vector.extract_strided_slice %192 {offsets = [0, 3, 0, 0], sizes = [2, 1, 8, 16], strides = [1, 1, 1, 1]} : vector<2x8x8x16xf32> to vector<2x1x8x16xf32>
    %213 = vector.shape_cast %212 : vector<2x1x8x16xf32> to vector<2x8x16xf32>
    %214 = vector.broadcast %211 : f32 to vector<2x8x16xf32>
    %215 = arith.mulf %214, %213 : vector<2x8x16xf32>
    %216 = arith.addf %210, %215 : vector<2x8x16xf32>
    %c28 = arith.constant 28 : index
    %217 = memref.load %arg7[%c28] : memref<32xf32, #tpu.memory_space<smem>>
    %218 = vector.extract_strided_slice %192 {offsets = [0, 4, 0, 0], sizes = [2, 1, 8, 16], strides = [1, 1, 1, 1]} : vector<2x8x8x16xf32> to vector<2x1x8x16xf32>
    %219 = vector.shape_cast %218 : vector<2x1x8x16xf32> to vector<2x8x16xf32>
    %220 = vector.broadcast %217 : f32 to vector<2x8x16xf32>
    %221 = arith.mulf %220, %219 : vector<2x8x16xf32>
    %222 = arith.addf %216, %221 : vector<2x8x16xf32>
    %c29 = arith.constant 29 : index
    %223 = memref.load %arg7[%c29] : memref<32xf32, #tpu.memory_space<smem>>
    %224 = vector.extract_strided_slice %192 {offsets = [0, 5, 0, 0], sizes = [2, 1, 8, 16], strides = [1, 1, 1, 1]} : vector<2x8x8x16xf32> to vector<2x1x8x16xf32>
    %225 = vector.shape_cast %224 : vector<2x1x8x16xf32> to vector<2x8x16xf32>
    %226 = vector.broadcast %223 : f32 to vector<2x8x16xf32>
    %227 = arith.mulf %226, %225 : vector<2x8x16xf32>
    %228 = arith.addf %222, %227 : vector<2x8x16xf32>
    %c30 = arith.constant 30 : index
    %229 = memref.load %arg7[%c30] : memref<32xf32, #tpu.memory_space<smem>>
    %230 = vector.extract_strided_slice %192 {offsets = [0, 6, 0, 0], sizes = [2, 1, 8, 16], strides = [1, 1, 1, 1]} : vector<2x8x8x16xf32> to vector<2x1x8x16xf32>
    %231 = vector.shape_cast %230 : vector<2x1x8x16xf32> to vector<2x8x16xf32>
    %232 = vector.broadcast %229 : f32 to vector<2x8x16xf32>
    %233 = arith.mulf %232, %231 : vector<2x8x16xf32>
    %234 = arith.addf %228, %233 : vector<2x8x16xf32>
    %c31 = arith.constant 31 : index
    %235 = memref.load %arg7[%c31] : memref<32xf32, #tpu.memory_space<smem>>
    %236 = vector.extract_strided_slice %192 {offsets = [0, 7, 0, 0], sizes = [2, 1, 8, 16], strides = [1, 1, 1, 1]} : vector<2x8x8x16xf32> to vector<2x1x8x16xf32>
    %237 = vector.shape_cast %236 : vector<2x1x8x16xf32> to vector<2x8x16xf32>
    %238 = vector.broadcast %235 : f32 to vector<2x8x16xf32>
    %239 = arith.mulf %238, %237 : vector<2x8x16xf32>
    %240 = arith.addf %234, %239 : vector<2x8x16xf32>
    %241 = tpu.iota {dimensions = array<i32: 2>} : vector<2x8x16xi32>
    %c0_12 = arith.constant 0 : index
    %c0_13 = arith.constant 0 : index
    %c0_14 = arith.constant 0 : index
    %242 = vector.load %arg1[%c0_12, %c0_13, %c0_14] : memref<2x1x1xi32, #tpu.memory_space<vmem>>, vector<2x1x1xi32>
    %243 = vector.broadcast %242 : vector<2x1x1xi32> to vector<2x8x16xi32>
    %244 = arith.cmpi slt, %241, %243 : vector<2x8x16xi32>
    %cst_15 = arith.constant -1.000000e+06 : f32
    %245 = vector.broadcast %cst_15 : f32 to vector<2x8x16xf32>
    %246 = arith.select %244, %240, %245 : vector<2x8x16xi1>, vector<2x8x16xf32>
    %cst_16 = arith.constant dense<0xFF800000> : vector<2x8xf32>
    %247 = vector.multi_reduction <maximumf>, %246, %cst_16 [2] : vector<2x8x16xf32> to vector<2x8xf32>
    %248 = vector.shape_cast %247 : vector<2x8xf32> to vector<2x8x1xf32>
    %249 = vector.broadcast %248 : vector<2x8x1xf32> to vector<2x8x16xf32>
    %250 = arith.subf %246, %249 : vector<2x8x16xf32>
    %251 = math.exp %250 : vector<2x8x16xf32>
    %cst_17 = arith.constant dense<0.000000e+00> : vector<2x8xf32>
    %252 = vector.multi_reduction <add>, %251, %cst_17 [2] : vector<2x8x16xf32> to vector<2x8xf32>
    %253 = vector.shape_cast %252 : vector<2x8xf32> to vector<2x8x1xf32>
    %254 = tpu.reciprocal %253 {approx = true} : vector<2x8x1xf32> -> vector<2x8x1xf32>
    %255 = vector.broadcast %254 : vector<2x8x1xf32> to vector<2x8x16xf32>
    %256 = arith.mulf %251, %255 : vector<2x8x16xf32>
    %257 = arith.truncf %256 : vector<2x8x16xf32> to vector<2x8x16xbf16>
    %c0_18 = arith.constant 0 : index
    %c0_19 = arith.constant 0 : index
    %c0_20 = arith.constant 0 : index
    %258 = vector.load %arg4[%c0_18, %c0_19, %c0_20] : memref<2x16x32xf32, #tpu.memory_space<vmem>>, vector<2x16x32xf32>
    %259 = arith.truncf %258 : vector<2x16x32xf32> to vector<2x16x32xbf16>
    "tpu.trace_start"() <{level = 10 : i32, message = "bqk,bkv->bqv"}> : () -> ()
    %cst_21 = arith.constant dense<0.000000e+00> : vector<2x8x32xf32>
    %260 = tpu.matmul %257, %259, %cst_21 {dimension_numbers = #tpu.dot_dimension_numbers<[2], [1], [1], [2], [0, 0, 0, 1, 1, 2], [0], [0]>} : vector<2x8x16xbf16>, vector<2x16x32xbf16>, vector<2x8x32xf32> -> vector<2x8x32xf32>
    "tpu.trace_stop"() : () -> ()
    %c0_22 = arith.constant 0 : index
    %c0_23 = arith.constant 0 : index
    %c0_24 = arith.constant 0 : index
    %261 = vector.load %arg8[%c0_22, %c0_23, %c0_24] : memref<2x8x32xf32, #tpu.memory_space<vmem>>, vector<2x8x32xf32>
    tpu.vector_store %arg8[%c0_22, %c0_23, %c0_24], %260 {strides = array<i32>} : memref<2x8x32xf32, #tpu.memory_space<vmem>>, vector<2x8x32xf32>,
    return
  }
  func.func @transform_0(%arg0: i32) -> (i32, i32, i32) {
    %c0_i32 = arith.constant 0 : i32
    %c0_i32_0 = arith.constant 0 : i32
    %c0_i32_1 = arith.constant 0 : i32
    return %arg0, %c0_i32, %c0_i32_0 : i32, i32, i32
  }
  func.func @transform_1(%arg0: i32) -> (i32, i32, i32) {
    %c0_i32 = arith.constant 0 : i32
    %c0_i32_0 = arith.constant 0 : i32
    %c0_i32_1 = arith.constant 0 : i32
    return %arg0, %c0_i32, %c0_i32_0 : i32, i32, i32
  }
  func.func @transform_2(%arg0: i32) -> (i32, i32, i32) {
    %c0_i32 = arith.constant 0 : i32
    %c0_i32_0 = arith.constant 0 : i32
    %c0_i32_1 = arith.constant 0 : i32
    return %arg0, %c0_i32, %c0_i32_0 : i32, i32, i32
  }
  func.func @transform_3(%arg0: i32) -> (i32, i32, i32) {
    %c0_i32 = arith.constant 0 : i32
    %c0_i32_0 = arith.constant 0 : i32
    %c0_i32_1 = arith.constant 0 : i32
    return %arg0, %c0_i32, %c0_i32_0 : i32, i32, i32
  }
  func.func @transform_4(%arg0: i32) -> (i32, i32) {
    %c0_i32 = arith.constant 0 : i32
    %c0_i32_0 = arith.constant 0 : i32
    %c0_i32_1 = arith.constant 0 : i32
    return %c0_i32, %c0_i32_0 : i32, i32
  }
  func.func @transform_5(%arg0: i32) -> (i32, i32) {
    %c0_i32 = arith.constant 0 : i32
    %c0_i32_0 = arith.constant 0 : i32
    %c0_i32_1 = arith.constant 0 : i32
    return %c0_i32, %c0_i32_0 : i32, i32
  }
  func.func @transform_6(%arg0: i32) -> i32 {
    %c0_i32 = arith.constant 0 : i32
    %c0_i32_0 = arith.constant 0 : i32
    return %c0_i32 : i32
  }
  func.func @transform_7(%arg0: i32) -> (i32, i32, i32) {
    %c0_i32 = arith.constant 0 : i32
    %c0_i32_0 = arith.constant 0 : i32
    %c0_i32_1 = arith.constant 0 : i32
    return %arg0, %c0_i32, %c0_i32_0 : i32, i32, i32
  }
}

</mosaic_0001>

<bundles_post_ra>
// kernel: additive_attention.1
= control target key start
LH: loop header
LB: loop body
LE: loop exit
PB: predicated region body
PF: predicated region fallthrough
CT: control target
= control target key end

     0   :  { %12 = vsyncpa [#allocation3], 0  ;;  %s2158_s0 = inlined_call_operand.vmem [shape: s32[2,1,1], index: 0, kind: input, shape index: {}]   ;;  %s2159_s1 = inlined_call_operand.hbm [shape: f32[2,8,32], index: 1, kind: input, shape index: {}]   ;;  %s2160_s2 = inlined_call_operand.hbm [shape: f32[2,16,16], index: 2, kind: input, shape index: {}]   ;;  %s2161_s3 = inlined_call_operand.hbm [shape: f32[2,16,32], index: 3, kind: input, shape index: {}]   ;;  %s2162_s4 = inlined_call_operand.hbm [shape: f32[32,32], index: 4, kind: input, shape index: {}]   ;;  %s2163_s5 = inlined_call_operand.hbm [shape: f32[16,32], index: 5, kind: input, shape index: {}]   ;;  %s2164_s6 = inlined_call_operand.vmem [shape: f32[32], index: 6, kind: input, shape index: {}]   ;;  %s2165_s7 = inlined_call_operand.hbm [shape: f32[2,8,32], index: 7, kind: output, shape index: {}]  }
   0x1   :  { %13 = vsyncpa [#allocation7], 0 }
   0x2   :  { %14 = vsyncpa [#allocation10], 0 }
   0x3   :  { %15 = vsyncpa [#allocation5], 0 }
   0x4   :  { %16 = vsyncpa [#allocation4], 0  ;;  %s36_s26 = sshll.u32 %s2160_s2, 4  ;;  %s1742_s27 = smov [#allocation6]   ;;  %s37_s26 = int_to_ptr.hbm [resolvable:$true] %s36_s26 }
   0x5   :  { %s38_s28 = sshll.u32 %s1742_s27, 4  ;;  %s62_s8 = sshll.u32 %s2162_s4, 4  ;;  %s39_s28 = int_to_ptr.vmem [resolvable:$true] %s38_s28  ;;  %s63_s8 = int_to_ptr.hbm [resolvable:$true] %s62_s8 }
   0x6   :  { %s1743_s9 = smov 128   ;;  %s1744_s10 = smov 8  }
   0x7   :  { %44 = dma.hbm_to_vmem [thread:$0]  %s37_s26, 512, %s39_s28, [#allocation7], %s1743_s9, %s1743_s9, %s1744_s10  }
   0x8   :  { %s1745_s11 = smov [#allocation9]   ;;  %s23_s2 = sshll.u32 %s2159_s1, 4  ;;  %s24_s2 = int_to_ptr.hbm [resolvable:$true] %s23_s2 }
   0x9   :  { %s64_s12 = sshll.u32 %s1745_s11, 4  ;;  %s49_s16 = sshll.u32 %s2161_s3, 4  ;;  %s65_s12 = int_to_ptr.vmem [resolvable:$true] %s64_s12  ;;  %s50_s16 = int_to_ptr.hbm [resolvable:$true] %s49_s16 }
   0xa   :  { %70 = dma.hbm_to_vmem [thread:$0]  %s63_s8, 512, %s65_s12, [#allocation10], %s1743_s9, %s1743_s9, %s1744_s10  }
   0xb   :  { %s1746_s17 = smov [#allocation2]   ;;  %s1747_s19 = smov [#allocation8]  }
   0xc   :  { %s25_s18 = sshll.u32 %s1746_s17, 4  ;;  %s51_s1 = sshll.u32 %s1747_s19, 4  ;;  %s26_s18 = int_to_ptr.vmem [resolvable:$true] %s25_s18  ;;  %s52_s1 = int_to_ptr.vmem [resolvable:$true] %s51_s1 }
   0xd   :  { %31 = dma.hbm_to_vmem [thread:$0]  %s24_s2, 256, %s26_s18, [#allocation3], %s1743_s9, %s1743_s9, %s1744_s10  }
   0xe   :  { %s75_s22 = sshll.u32 %s2163_s5, 4  ;;  %s89_s24 = sshll.u32 %s2164_s6, 4  ;;  %s76_s22 = int_to_ptr.hbm [resolvable:$true] %s75_s22  ;;  %s90_s24 = int_to_ptr.vmem [resolvable:$true] %s89_s24 }
   0xf   :  { %57 = dma.hbm_to_vmem [thread:$0]  %s50_s16, 512, %s52_s1, [#allocation7], %s1743_s9, %s1743_s9, %s1744_s10  }
  0x10   :  { %s1748_s25 = smov [#allocation11]   ;;  %s1749_s27 = smov [#allocation12]  }
  0x11   :  { %s77_s26 = sshll.u32 %s1748_s25, 4  ;;  %s78_s26 = int_to_ptr.vmem [resolvable:$true] %s77_s26 }
  0x12   :  { %83 = dma.hbm_to_vmem [thread:$0]  %s76_s22, 256, %s78_s26, [#allocation10], %s1743_s9, %s1743_s9, %s1744_s10  }
  0x13   :  { %92 = dma.vmem_to_smem %s90_s24, 16, %s1749_s27, [#allocation5]  }
  0x14   :  { %1732 = dma.done.wait [#allocation3], 256  }
  0x15   :  { %1733 = vsyncadd [#allocation3], 4294967040 }
  0x16   :  { %1734 = dma.done.wait [#allocation7], 1024  }
  0x17   :  { %1735 = vsyncadd [#allocation7], 4294966272 }
  0x18   :  { %1736 = dma.done.wait [#allocation10], 768  }
  0x19   :  { %1737 = vsyncadd [#allocation10], 4294966528 }
  0x1a   :  { %1738 = dma.done.wait [#allocation5], 16  }
  0x1b   :  { %1739 = vsyncadd [#allocation5], 4294967280 }
  0x1c   :  { %117 = sfence }
  0x1d   :  { %v124_v0 = vld [vmem:[#allocation9 + $0x10] sm:$0xff]  ;;  %v125_v1 = vld [vmem:[#allocation9 + $0x18] sm:$0xff]  ;;  %v122_v2 = vld [vmem:[#allocation9] sm:$0xff]  ;;  %vm155_vm0 = vcmask 130048   ;;  %vm128_vm1 = vcmask 261120   ;;  %v310_v24 = vlaneseq  ;;  %s1880_s5 = sld [smem:[#allocation12 + $0x1]] }
  0x1e   :  { %v127_v3 = vpack.c.bf16 %v125_v1, %v124_v0  ;;  %v123_v4 = vld [vmem:[#allocation9 + $0x8] sm:$0xff]  ;;  %v152_v5 = vld [vmem:[#allocation11] sm:$0xff]  ;;  %v119_v9 = vld [vmem:[#allocation2] sm:$0xff]  ;;  %s1883_s6 = sld [smem:[#allocation12]] }
  0x1f   :  { %v153_v6 = vld [vmem:[#allocation11 + $0x8] sm:$0xff]  ;;  %v146_v7 = vld [vmem:[#allocation6] sm:$0xff]  ;;  %v126_v8 = vpack.c.bf16 %v123_v4, %v122_v2  ;;  %v120_v10 = vld [vmem:[#allocation2 + $0x8] sm:$0xff]  ;;  %v311_v25 = vshrl.u32 %v310_v24, 7  ;;  %s1885_s28 = sld [smem:[#allocation12 + $0x2]] }
  0x20   :  { %138 = vmatpush.bf16.msra.mxu0 %v127_v3  ;;  %v154_v11 = vpack.c.bf16 %v153_v6, %v152_v5  ;;  %v147_v12 = vld [vmem:[#allocation6 + $0x8] sm:$0xff]  ;;  %v121_v14 = vpack.c.bf16 %v120_v10, %v119_v9  ;;  %v148_v15 = vld [vmem:[#allocation6 + $0x10] sm:$0xff]  ;;  %v149_v16 = vld [vmem:[#allocation6 + $0x18] sm:$0xff]  ;;  %s1894_s29 = sld [smem:[#allocation12 + $0x3]] }
  0x21   :  { %v150_v13 = vpack.c.bf16 %v147_v12, %v146_v7  ;;  %v151_v17 = vpack.c.bf16 %v149_v16, %v148_v15  ;;  %s1911_s30 = sld [smem:[#allocation12 + $0x4]] }
  0x22   :  { %169 = vmatpush.bf16.msra.mxu1 %v154_v11  ;;  %s1913_s8 = sld [smem:[#allocation12 + $0x5]] }
  0x23   :  { %s1926_s11 = sld [smem:[#allocation12 + $0x6]] }
  0x24   :  { %139 = vmatpush.bf16.msra.mxu0 %v126_v8  ;;  %s1929_s12 = sld [smem:[#allocation12 + $0x7]] }
  0x25   :  { %1386 = vmatmul.msk.bf16.vlgmr.msra.gmra.mxu1 %vm155_vm0, %v150_v13  ;;  %s1944_s13 = sld [smem:[#allocation12 + $0x8]] }
  0x26   :  { %s1964_s14 = sld [smem:[#allocation12 + $0x9]] }
  0x27   :  { %1385 = vmatmul.msk.bf16.vlgmr.msra.gmra.mxu0 %vm128_vm1, %v121_v14  ;;  %s2006_s2 = sld [smem:[#allocation12 + $0xb]] }
  0x28   :  { %s2009_s4 = sld [smem:[#allocation12 + $0xa]] }
  0x29   :  { %s2014_s15 = sld [smem:[#allocation12 + $0xc]] }
  0x2a   :  { %s2055_s1 = sld [smem:[#allocation12 + $0xe]] }
  0x2b   :  { %s2058_s20 = sld [smem:[#allocation12 + $0xf]] }
  0x2c   :  { %s2066_s21 = sld [smem:[#allocation12 + $0x10]] }
  0x2d   :  { %s2073_s22 = sld [smem:[#allocation12 + $0x11]] }
  0x2e   :  { %s2076_s3 = sld [smem:[#allocation12 + $0x12]] }
  0x2f   :  { %s2083_s23 = sld [smem:[#allocation12 + $0x13]] }
  0x30   :  { %s2088_s24 = sld [smem:[#allocation12 + $0x14]] }
  0x31   :  { %s2091_s25 = sld [smem:[#allocation12 + $0x15]] }
  0x32   :  { %s2098_s26 = sld [smem:[#allocation12 + $0x16]] }
  0x33   :  { %s2102_s27 = sld [smem:[#allocation12 + $0x17]] }
  0x35   :  { %1387 = vmatmul.msk.bf16.gmra.mxu1 %vm155_vm0, %v151_v17 }
  0xa2   :  { %v171_v18 = vpop.f32.mrf.mxu1 }
  0xa3   :  { %245 = vxpose.xlu1.b32.start [1/2] (short) (narrow) %v171_v18, 32 }
  0xa4   :  { %v141_v19 = vpop.f32.mrf.mxu0 }
  0xa5   :  { %181 = vxpose.xlu0.b32.start.end [1/1] (short) (narrow) %v141_v19, 32 }
  0xaa   :  { %v173_v20 = vpop.f32.mrf.mxu1 }
  0xab   :  { %246 = vxpose.xlu1.b32.end [2/2] (short) (narrow) %v173_v20, 32 }
  0xac   :  { %v143_v23 = vpop.f32.mrf.mxu0 }
  0xb2   :  { %v176_v21 = vpop.f32.mrf.mxu1 }
  0xb3   :  { %277 = vxpose.xlu2.b32.start [1/2] (short) (narrow) %v176_v21, 32 }
  0xba   :  { %v178_v22 = vpop.f32.mrf.mxu1 }
  0xbb   :  { %278 = vxpose.xlu2.b32.end [2/2] (short) (narrow) %v178_v22, 32 }
  0xc5   :  { %213 = vxpose.xlu0.b32.start.end [1/1] (short) (narrow) %v143_v23, 32 }
  0xfe   :  { %1432 = vset.pattern.permute.xlu1 %v311_v25 }
 0x11d   :  { %1433 = vset.pattern.permute.xlu2 %v311_v25 }
 0x12c   :  { %1434 = vset.pattern.permute.xlu0 %v311_v25 }
 0x147   :  { %v1849_v62 = vpop.trf.xlu1 }
 0x148   :  { %v423_v4 = vrot.slane %v1849_v62, 1  ;;  %v427_v12 = vrot.slane %v1849_v62, 5  ;;  %v429_v19 = vrot.slane %v1849_v62, 7 }
 0x149   :  { %v197_v26 = vpop.trf.xlu0 }
 0x14a   :  { %v316_v27 = vperm.slane %v197_v26, 1  ;;  %v309_v28 = vperm.slane %v197_v26, 0  ;;  %v323_v29 = vperm.slane %v197_v26, 2  ;;  %v344_v31 = vperm.slane %v197_v26, 5 }
 0x14b   :  { %v330_v32 = vperm.slane %v197_v26, 3  ;;  %v358_v34 = vperm.slane %v197_v26, 7  ;;  %v337_v35 = vperm.slane %v197_v26, 4  ;;  %v351_v37 = vperm.slane %v197_v26, 6 }
 0x14c   :  { %321 = vperm.xlu2 %1433, %v316_v27   ;;  %314 = vperm.xlu1 %1432, %v309_v28   ;;  %v1837_v49 = vpop.trf.xlu2  ;;  %v438_v8 = vperm.slane %v423_v4, 0  ;;  %v442_v16 = vperm.slane %v427_v12, 0  ;;  %v444_v25 = vperm.slane %v429_v19, 0  ;;  %v426_v4 = vrot.slane %v1849_v62, 4 }
 0x14d   :  { %328 = vperm.xlu0 %1434, %v323_v29  }
 0x14e   :  { %v441_v12 = vperm.slane %v426_v4, 0 }
 0x14f   :  { %v1854_v3 = vpop.trf.xlu1 }
 0x151   :  { %v1829_v30 = vpop.trf.xlu0 }
 0x152   :  { %v556_v42 = vperm.slane %v1829_v30, 1  ;;  %v577_v45 = vperm.slane %v1829_v30, 4  ;;  %v549_v51 = vperm.slane %v1829_v30, 0  ;;  %v570_v55 = vperm.slane %v1829_v30, 3 }
 0x153   :  { %v563_v56 = vperm.slane %v1829_v30, 2  ;;  %v598_v59 = vperm.slane %v1829_v30, 7  ;;  %v591_v5 = vperm.slane %v1829_v30, 6  ;;  %v584_v7 = vperm.slane %v1829_v30, 5 }
 0x154   :  { %349 = vperm.xlu2 %1433, %v344_v31   ;;  %335 = vperm.xlu1 %1432, %v330_v32   ;;  %v1840_v54 = vpop.trf.xlu2  ;;  %v424_v31 = vrot.slane %v1849_v62, 2 }
 0x157   :  { %v1862_v14 = vpop.trf.xlu1 }
 0x159   :  { %v1831_v33 = vpop.trf.xlu0 }
 0x15a   :  { %v803_v6 = vperm.slane %v1831_v33, 2  ;;  %v796_v20 = vperm.slane %v1831_v33, 1  ;;  %v824_v21 = vperm.slane %v1831_v33, 5  ;;  %v789_v22 = vperm.slane %v1831_v33, 0 }
 0x15c   :  { %363 = vperm.xlu2 %1433, %v358_v34   ;;  %342 = vperm.xlu1 %1432, %v337_v35   ;;  %v1845_v60 = vpop.trf.xlu2  ;;  %v437_v34 = vperm.slane %v1849_v62, 0 }
 0x15f   :  { %v1870_v23 = vpop.trf.xlu1 }
 0x161   :  { %v1833_v36 = vpop.trf.xlu0 }
 0x164   :  { %356 = vperm.xlu1 %1432, %v351_v37   ;;  %v1852_v2 = vpop.trf.xlu2  ;;  %v439_v37 = vperm.slane %v424_v31, 0  ;;  %v831_v31 = vperm.slane %v1831_v33, 6 }
 0x169   :  { %v229_v38 = vpop.trf.xlu0 }
 0x16a   :  { %v414_v39 = vperm.slane %v229_v38, 7  ;;  %v372_v40 = vperm.slane %v229_v38, 1  ;;  %v365_v41 = vperm.slane %v229_v38, 0  ;;  %v386_v43 = vperm.slane %v229_v38, 3 }
 0x16b   :  { %v379_v44 = vperm.slane %v229_v38, 2  ;;  %v400_v46 = vperm.slane %v229_v38, 5  ;;  %v393_v47 = vperm.slane %v229_v38, 4  ;;  %v407_v52 = vperm.slane %v229_v38, 6 }
 0x16c   :  { %419 = vperm.xlu0 %1434, %v414_v39   ;;  %377 = vperm.xlu2 %1433, %v372_v40  }
 0x16d   :  { %370 = vperm.xlu1 %1432, %v365_v41   ;;  %v425_v41 = vrot.slane %v1849_v62, 3 }
 0x171   :  { %v230_v48 = vpop.trf.xlu0 }
 0x172   :  { %v619_v50 = vperm.slane %v230_v48, 2  ;;  %v640_v53 = vperm.slane %v230_v48, 5  ;;  %v612_v57 = vperm.slane %v230_v48, 1  ;;  %v605_v58 = vperm.slane %v230_v48, 0 }
 0x173   :  { %v633_v0 = vperm.slane %v230_v48, 4  ;;  %v626_v1 = vperm.slane %v230_v48, 3  ;;  %v654_v13 = vperm.slane %v230_v48, 7  ;;  %v647_v15 = vperm.slane %v230_v48, 6 }
 0x174   :  { %561 = vperm.xlu0 %1434, %v556_v42   ;;  %391 = vperm.xlu2 %1433, %v386_v43   ;;  %v430_v42 = vrot.slane %v1837_v49, 1  ;;  %v817_v43 = vperm.slane %v1831_v33, 4  ;;  %v502_v48 = vstv %s1883_s6  ;;  %s2113_s6 = sld [smem:[#allocation12 + $0x19]] }
 0x175   :  { %384 = vperm.xlu1 %1432, %v379_v44   ;;  %v1029_v44 = vperm.slane %v1833_v36, 0 }
 0x179   :  { %v1847_v61 = vpop.trf.xlu0 }
 0x17a   :  { %v845_v63 = vperm.slane %v1847_v61, 0  ;;  %v866_v11 = vperm.slane %v1847_v61, 3  ;;  %v859_v29 = vperm.slane %v1847_v61, 2  ;;  %v887_v30 = vperm.slane %v1847_v61, 6 }
 0x17b   :  { %v852_v32 = vperm.slane %v1847_v61, 1 }
 0x17c   :  { %582 = vperm.xlu0 %1434, %v577_v45   ;;  %405 = vperm.xlu2 %1433, %v400_v46   ;;  %v810_v45 = vperm.slane %v1831_v33, 3 }
 0x17d   :  { %398 = vperm.xlu1 %1432, %v393_v47   ;;  %v508_v47 = vstv %s1880_s5  ;;  %s2105_s5 = sld [smem:[#allocation12 + $0x18]] }
 0x181   :  { %v1872_v26 = vpop.trf.xlu0 }
 0x184   :  { %554 = vperm.xlu2 %1433, %v549_v51   ;;  %624 = vperm.xlu0 %1434, %v619_v50   ;;  %v440_v50 = vperm.slane %v425_v41, 0  ;;  %v446_v51 = vperm.slane %v430_v42, 0  ;;  %v1113_v42 = vperm.slane %v1872_v26, 4 }
 0x185   :  { %412 = vperm.xlu1 %1432, %v407_v52  }
 0x18c   :  { %575 = vperm.xlu2 %1433, %v570_v55   ;;  %645 = vperm.xlu0 %1434, %v640_v53  }
 0x18d   :  { %568 = vperm.xlu1 %1432, %v563_v56   ;;  %v514_v56 = vstv %s1885_s28  ;;  %s2118_s28 = sld [smem:[#allocation12 + $0x1a]] }
 0x194   :  { %603 = vperm.xlu0 %1434, %v598_v59   ;;  %617 = vperm.xlu2 %1433, %v612_v57  }
 0x195   :  { %610 = vperm.xlu1 %1432, %v605_v58  }
 0x19c   :  { %638 = vperm.xlu2 %1433, %v633_v0   ;;  %850 = vperm.xlu0 %1434, %v845_v63  }
 0x19d   :  { %631 = vperm.xlu1 %1432, %v626_v1   ;;  %v1092_v1 = vperm.slane %v1872_v26, 1 }
 0x1a4   :  { %596 = vperm.xlu2 %1433, %v591_v5   ;;  %808 = vperm.xlu0 %1434, %v803_v6   ;;  %v432_v5 = vrot.slane %v1837_v49, 3 }
 0x1a5   :  { %589 = vperm.xlu1 %1432, %v584_v7  }
 0x1a6   :  { %v322_v9 = vpop.permute.xlu2 %321 }
 0x1a7   :  { %v470_v10 = vadd.f32 %v438_v8, %v322_v9  ;;  %v880_v8 = vperm.slane %v1847_v61, 5  ;;  %v873_v9 = vperm.slane %v1847_v61, 4 }
 0x1a9   :  { %1440 = vtanh.f32 %v470_v10 }
 0x1ac   :  { %659 = vperm.xlu2 %1433, %v654_v13   ;;  %871 = vperm.xlu0 %1434, %v866_v11   ;;  %v520_v11 = vstv %s1894_s29  ;;  %v448_v13 = vperm.slane %v432_v5, 0  ;;  %s2121_s29 = sld [smem:[#allocation12 + $0x1b]] }
 0x1ad   :  { %652 = vperm.xlu1 %1432, %v647_v15  }
 0x1ae   :  { %v350_v17 = vpop.permute.xlu2 %349 }
 0x1af   :  { %v1864_v18 = vadd.f32 %v442_v16, %v350_v17  ;;  %v1441_v46 = vpop.eup %1440 }
 0x1b0   :  { %v509_v63 = vmul.f32 %v1441_v46, %v508_v47 }
 0x1b4   :  { %801 = vperm.xlu2 %1433, %v796_v20   ;;  %829 = vperm.xlu0 %1434, %v824_v21  }
 0x1b5   :  { %794 = vperm.xlu1 %1432, %v789_v22   ;;  %v428_v22 = vrot.slane %v1849_v62, 6 }
 0x1b6   :  { %v364_v27 = vpop.permute.xlu2 %363 }
 0x1b7   :  { %v1874_v28 = vadd.f32 %v444_v25, %v364_v27  ;;  %v434_v25 = vrot.slane %v1837_v49, 5 }
 0x1b9   :  { %v450_v62 = vperm.slane %v434_v25, 0 }
 0x1bc   :  { %864 = vperm.xlu2 %1433, %v859_v29   ;;  %892 = vperm.xlu0 %1434, %v887_v30   ;;  %v838_v29 = vperm.slane %v1831_v33, 7  ;;  %v1050_v30 = vperm.slane %v1833_v36, 3 }
 0x1bd   :  { %857 = vperm.xlu1 %1432, %v852_v32   ;;  %v526_v32 = vstv %s1911_s30  ;;  %s2128_s30 = sld [smem:[#allocation12 + $0x1c]] }
 0x1be   :  { %v315_v35 = vpop.permute.xlu1 %314 }
 0x1bf   :  { %v469_v38 = vadd.f32 %v437_v34, %v315_v35  ;;  %v329_v39 = vpop.permute.xlu0 %328 }
 0x1c0   :  { %v471_v40 = vadd.f32 %v439_v37, %v329_v39  ;;  %v532_v39 = vstv %s1913_s8  ;;  %s2133_s8 = sld [smem:[#allocation12 + $0x1d]] }
 0x1c1   :  { %1442 = vtanh.f32 %v469_v38 }
 0x1c2   :  { %1444 = vtanh.f32 %v471_v40 }
 0x1c4   :  { %822 = vperm.xlu2 %1433, %v817_v43   ;;  %1034 = vperm.xlu0 %1434, %v1029_v44   ;;  %v1085_v43 = vperm.slane %v1872_v26, 0  ;;  %v436_v44 = vrot.slane %v1837_v49, 7 }
 0x1c5   :  { %815 = vperm.xlu1 %1432, %v810_v45  }
 0x1c6   :  { %v336_v52 = vpop.permute.xlu1 %335  ;;  %v378_v53 = vpop.permute.xlu2 %377 }
 0x1c7   :  { %v1443_v55 = vpop.eup %1442  ;;  %v472_v57 = vadd.f32 %v440_v50, %v336_v52  ;;  %v1897_v58 = vadd.f32 %v446_v51, %v378_v53  ;;  %v894_v50 = vperm.slane %v1847_v61, 7  ;;  %v677_v52 = vperm.slane %v1854_v3, 0 }
 0x1c8   :  { %v1445_v59 = vpop.eup %1444  ;;  %v503_v0 = vmul.f32 %v1443_v55, %v502_v48  ;;  %v452_v53 = vperm.slane %v436_v44, 0 }
 0x1c9   :  { %1446 = vtanh.f32 %v472_v57  ;;  %v515_v7 = vmul.f32 %v1445_v59, %v514_v56  ;;  %v445_v59 = vperm.slane %v1837_v49, 0 }
 0x1ca   :  { %v511_v6 = vadd.f32 %v509_v63, %v503_v0  ;;  %1448 = vtanh.f32 %v1864_v18  ;;  %v443_v18 = vperm.slane %v428_v22, 0 }
 0x1cc   :  { %v517_v10 = vadd.f32 %v515_v7, %v511_v6  ;;  %885 = vperm.xlu2 %1433, %v880_v8   ;;  %1097 = vperm.xlu0 %1434, %v1092_v1   ;;  %v544_v1 = vstv %s1929_s12  ;;  %v1071_v8 = vperm.slane %v1833_v36, 6  ;;  %s1418_s12 = sld [smem:[#allocation12 + $0x1f]] }
 0x1cd   :  { %878 = vperm.xlu1 %1432, %v873_v9   ;;  %v1043_v9 = vperm.slane %v1833_v36, 2 }
 0x1ce   :  { %v343_v15 = vpop.permute.xlu1 %342  ;;  %v392_v16 = vpop.permute.xlu2 %391 }
 0x1cf   :  { %v1447_v17 = vpop.eup %1446  ;;  %v473_v19 = vadd.f32 %v441_v12, %v343_v15  ;;  %v1915_v20 = vadd.f32 %v448_v13, %v392_v16  ;;  %v663_v12 = vrot.slane %v1854_v3, 1  ;;  %v431_v16 = vrot.slane %v1837_v49, 2 }
 0x1d0   :  { %v521_v21 = vmul.f32 %v1447_v17, %v520_v11  ;;  %v1449_v34 = vpop.eup %1448 }
 0x1d1   :  { %1450 = vtanh.f32 %v473_v19  ;;  %v533_v45 = vmul.f32 %v1449_v34, %v532_v39  ;;  %v742_v19 = vstv %s1944_s13  ;;  %v678_v22 = vperm.slane %v663_v12, 0  ;;  %s1751_s13 = smov [#allocation13]  }
 0x1d2   :  { %v523_v27 = vadd.f32 %v521_v21, %v517_v10  ;;  %1452 = vtanh.f32 %v1874_v28  ;;  %v538_v28 = vstv %s1926_s11  ;;  %v665_v10 = vrot.slane %v1854_v3, 3  ;;  %s2138_s11 = sld [smem:[#allocation12 + $0x1e]] }
 0x1d3   :  { %v1057_v12 = vperm.slane %v1833_v36, 4 }
 0x1d4   :  { %843 = vperm.xlu2 %1433, %v838_v29   ;;  %1055 = vperm.xlu0 %1434, %v1050_v30   ;;  %v680_v21 = vperm.slane %v665_v10, 0  ;;  %v447_v29 = vperm.slane %v431_v16, 0 }
 0x1d5   :  { %836 = vperm.xlu1 %1432, %v831_v31  }
 0x1d6   :  { %v357_v35 = vpop.permute.xlu1 %356  ;;  %v406_v37 = vpop.permute.xlu2 %405 }
 0x1d7   :  { %v1451_v38 = vpop.eup %1450  ;;  %v475_v40 = vadd.f32 %v443_v18, %v357_v35  ;;  %v1931_v33 = vadd.f32 %v450_v62, %v406_v37 }
 0x1d8   :  { %v527_v41 = vmul.f32 %v1451_v38, %v526_v32  ;;  %v1453_v55 = vpop.eup %1452 }
 0x1d9   :  { %1454 = vtanh.f32 %v475_v40  ;;  %v545_v13 = vmul.f32 %v1453_v55, %v544_v1  ;;  %v666_v40 = vrot.slane %v1854_v3, 4  ;;  %v748_v55 = vstv %s1964_s14  ;;  %s1367_s14 = sshll.u32 %s1751_s13, 4  ;;  %s1368_s14 = int_to_ptr.vmem [resolvable:$true] %s1367_s14 }
 0x1da   :  { %v529_v46 = vadd.f32 %v527_v41, %v523_v27  ;;  %1456 = vtanh.f32 %v1897_v58  ;;  %v1036_v58 = vperm.slane %v1833_v36, 1 }
 0x1dc   :  { %v535_v51 = vadd.f32 %v533_v45, %v529_v46  ;;  %1118 = vperm.xlu0 %1434, %v1113_v42   ;;  %1090 = vperm.xlu2 %1433, %v1085_v43   ;;  %v433_v43 = vrot.slane %v1837_v49, 4  ;;  %v1134_v45 = vperm.slane %v1872_v26, 7  ;;  %v1106_v46 = vperm.slane %v1872_v26, 3 }
 0x1dd   :  { %899 = vperm.xlu1 %1432, %v894_v50  }
 0x1de   :  { %v555_v57 = vpop.permute.xlu2 %554  ;;  %v420_v63 = vpop.permute.xlu0 %419 }
 0x1df   :  { %v1455_v0 = vpop.eup %1454  ;;  %v709_v61 = vadd.f32 %v677_v52, %v555_v57  ;;  %v371_v4 = vpop.permute.xlu1 %370  ;;  %v1948_v5 = vadd.f32 %v452_v53, %v420_v63 }
 0x1e0   :  { %v539_v6 = vmul.f32 %v1455_v0, %v538_v28  ;;  %v477_v7 = vadd.f32 %v445_v59, %v371_v4  ;;  %v1457_v25 = vpop.eup %1456 }
 0x1e1   :  { %1458 = vtanh.f32 %v709_v61  ;;  %v510_v41 = vmul.f32 %v1457_v25, %v508_v47  ;;  %v681_v47 = vperm.slane %v666_v40, 0  ;;  %v1127_v25 = vperm.slane %v1872_v26, 6 }
 0x1e2   :  { %v541_v15 = vadd.f32 %v539_v6, %v535_v51  ;;  %1460 = vtanh.f32 %v477_v7  ;;  %v1099_v51 = vperm.slane %v1872_v26, 2  ;;  %v1064_v7 = vperm.slane %v1833_v36, 5 }
 0x1e3   :  { %1462 = vtanh.f32 %v1915_v20 }
 0x1e4   :  { %v547_v17 = vadd.f32 %v545_v13, %v541_v15  ;;  %1076 = vperm.xlu0 %1434, %v1071_v8   ;;  %1048 = vperm.xlu2 %1433, %v1043_v9   ;;  %v435_v8 = vrot.slane %v1837_v49, 6  ;;  %v1750_v15 = vmov 0  }
 0x1e5   :  { %1041 = vperm.xlu1 %1432, %v1036_v58  }
 0x1e6   :  { %v576_v27 = vpop.permute.xlu2 %575  ;;  %v562_v30 = vpop.permute.xlu0 %561 }
 0x1e7   :  { %v1459_v31 = vpop.eup %1458  ;;  %v1962_v18 = vadd.f32 %v680_v21, %v576_v27  ;;  %v385_v62 = vpop.permute.xlu1 %384  ;;  %v710_v34 = vadd.f32 %v678_v22, %v562_v30  ;;  %v664_v27 = vrot.slane %v1854_v3, 2 }
 0x1e8   :  { %v1461_v35 = vpop.eup %1460  ;;  %v743_v37 = vmul.f32 %v1459_v31, %v742_v19  ;;  %v479_v38 = vadd.f32 %v447_v29, %v385_v62  ;;  %v1120_v31 = vperm.slane %v1872_v26, 5 }
 0x1e9   :  { %v504_v42 = vmul.f32 %v1461_v35, %v502_v48  ;;  %v449_v48 = vperm.slane %v433_v43, 0  ;;  %v1463_v53 = vpop.eup %1462 }
 0x1ea   :  { %v745_v44 = vadd.f32 %v743_v37, %v547_v17  ;;  %1464 = vtanh.f32 %v479_v38  ;;  %v522_v9 = vmul.f32 %v1463_v53, %v520_v11  ;;  %v670_v37 = vrot.slane %v1840_v54, 1 }
 0x1eb   :  { %v512_v50 = vadd.f32 %v510_v41, %v504_v42  ;;  %1466 = vtanh.f32 %v710_v34  ;;  %v679_v34 = vperm.slane %v664_v27, 0  ;;  %v671_v41 = vrot.slane %v1840_v54, 2 }
 0x1ec   :  { %1139 = vperm.xlu0 %1434, %v1134_v45   ;;  %1111 = vperm.xlu2 %1433, %v1106_v46   ;;  %1468 = vtanh.f32 %v1931_v33  ;;  %v451_v33 = vperm.slane %v435_v8, 0  ;;  %v686_v43 = vperm.slane %v670_v37, 0  ;;  %v1078_v45 = vperm.slane %v1833_v36, 7 }
 0x1ed   :  { %1104 = vperm.xlu1 %1432, %v1099_v51   ;;  %v687_v46 = vperm.slane %v671_v41, 0  ;;  %v685_v51 = vperm.slane %v1840_v54, 0  ;;  %v760_v36 = vstv %s2006_s2  ;;  %v672_v8 = vrot.slane %v1840_v54, 3 }
 0x1ee   :  { %v1978_v20 = vpop.permute.xlu2 %617  ;;  %v583_v52 = vpop.permute.xlu0 %582 }
 0x1ef   :  { %v399_v57 = vpop.permute.xlu1 %398  ;;  %v713_v59 = vadd.f32 %v681_v47, %v583_v52 }
 0x1f0   :  { %v1465_v63 = vpop.eup %1464  ;;  %v481_v0 = vadd.f32 %v449_v48, %v399_v57  ;;  %v673_v48 = vrot.slane %v1840_v54, 4  ;;  %v754_v57 = vstv %s2009_s4 }
 0x1f1   :  { %v1467_v61 = vpop.eup %1466  ;;  %v516_v4 = vmul.f32 %v1465_v63, %v514_v56 }
 0x1f2   :  { %v749_v6 = vmul.f32 %v1467_v61, %v748_v55  ;;  %1470 = vtanh.f32 %v481_v0  ;;  %v1469_v49 = vpop.eup %1468 }
 0x1f3   :  { %v518_v10 = vadd.f32 %v516_v4, %v512_v50  ;;  %1472 = vtanh.f32 %v1948_v5  ;;  %v534_v29 = vmul.f32 %v1469_v49, %v532_v39  ;;  %v766_v4 = vstv %s2014_s15  ;;  %s1369_s15 = sshll.u32 %s2165_s7, 4  ;;  %s1370_s15 = int_to_ptr.hbm [resolvable:$true] %s1369_s15 }
 0x1f4   :  { %v1991_v13 = vadd.f32 %v749_v6, %v745_v44  ;;  %1069 = vperm.xlu2 %1433, %v1064_v7   ;;  %1437 = vset.pattern.permute.xlu0 %v1750_v15  ;;  %v674_v6 = vrot.slane %v1840_v54, 5  ;;  %v1438_v7 = vld [vmem:[%s2158_s0 + $0x1] ss:$0 sm:$0xff] }
 0x1f5   :  { %v524_v56 = vadd.f32 %v522_v9, %v518_v10  ;;  %1062 = vperm.xlu1 %1432, %v1057_v12   ;;  %v689_v10 = vperm.slane %v673_v48, 0 }
 0x1f6   :  { %v1994_v16 = vpop.permute.xlu2 %638  ;;  %v625_v58 = vpop.permute.xlu0 %624  ;;  %v690_v49 = vperm.slane %v674_v6, 0 }
 0x1f7   :  { %v413_v17 = vpop.permute.xlu1 %412 }
 0x1f8   :  { %v1471_v11 = vpop.eup %1470  ;;  %v483_v21 = vadd.f32 %v451_v33, %v413_v17  ;;  %v721_v33 = vadd.f32 %v689_v10, %v1994_v16  ;;  %v688_v17 = vperm.slane %v672_v8, 0  ;;  %v778_v8 = vstv %s2055_s1 }
 0x1f9   :  { %v528_v22 = vmul.f32 %v1471_v11, %v526_v32  ;;  %v1473_v32 = vpop.eup %1472 }
 0x1fa   :  { %1474 = vtanh.f32 %v483_v21  ;;  %v546_v42 = vmul.f32 %v1473_v32, %v544_v1 }
 0x1fb   :  { %v530_v30 = vadd.f32 %v528_v22, %v524_v56  ;;  %1476 = vtanh.f32 %v1962_v18  ;;  %v718_v18 = vadd.f32 %v686_v43, %v1978_v20  ;;  %v1439_v20 = vld [vmem:[%s2158_s0] ss:$0 sm:$0xff]  ;;  %v668_v22 = vrot.slane %v1854_v3, 6  ;;  %s2047_s0 = sld [smem:[#allocation12 + $0xd]] }
 0x1fc   :  { %1132 = vperm.xlu2 %1433, %v1127_v25   ;;  %v676_v43 = vrot.slane %v1840_v54, 7 }
 0x1fd   :  { %v536_v62 = vadd.f32 %v534_v29, %v530_v30  ;;  %1125 = vperm.xlu1 %1432, %v1120_v31   ;;  %v683_v37 = vperm.slane %v668_v22, 0 }
 0x1fe   :  { %v2004_v35 = vpop.permute.xlu2 %596  ;;  %v646_v5 = vpop.permute.xlu0 %645 }
 0x1ff   :  { %v569_v38 = vpop.permute.xlu1 %568  ;;  %v722_v29 = vadd.f32 %v690_v49, %v646_v5 }
 0x200   :  { %v1475_v40 = vpop.eup %1474  ;;  %v711_v39 = vadd.f32 %v679_v34, %v569_v38  ;;  %v667_v34 = vrot.slane %v1854_v3, 5 }
 0x201   :  { %v540_v26 = vmul.f32 %v1475_v40, %v538_v28  ;;  %v1477_v47 = vpop.eup %1476  ;;  %v715_v40 = vadd.f32 %v683_v37, %v2004_v35 }
 0x202   :  { %1478 = vtanh.f32 %v711_v39  ;;  %v761_v9 = vmul.f32 %v1477_v47, %v760_v36  ;;  %v675_v47 = vrot.slane %v1840_v54, 6 }
 0x203   :  { %v542_v44 = vadd.f32 %v540_v26, %v536_v62  ;;  %1480 = vtanh.f32 %v713_v59  ;;  %v719_v59 = vadd.f32 %v687_v46, %v625_v58  ;;  %v669_v62 = vrot.slane %v1854_v3, 7 }
 0x204   :  { %1435 = vset.pattern.permute.xlu2 %v1750_v15  ;;  %1482 = vtanh.f32 %v718_v18 }
 0x205   :  { %1083 = vperm.xlu1 %1432, %v1078_v45   ;;  %v548_v28 = vadd.f32 %v546_v42, %v542_v44  ;;  %1276 = vperm.xlu2 %1435, %v1439_v20   ;;  %v684_v26 = vperm.slane %v669_v62, 0 }
 0x206   :  { %v2022_v50 = vpop.permute.xlu2 %659  ;;  %v604_v1 = vpop.permute.xlu0 %603 }
 0x207   :  { %v611_v52 = vpop.permute.xlu1 %610  ;;  %v716_v3 = vadd.f32 %v684_v26, %v604_v1 }
 0x208   :  { %v1479_v53 = vpop.eup %1478  ;;  %v717_v63 = vadd.f32 %v685_v51, %v611_v52  ;;  %v772_v51 = vstv %s2047_s0  ;;  %v692_v52 = vperm.slane %v676_v43, 0 }
 0x209   :  { %v755_v0 = vmul.f32 %v1479_v53, %v754_v57  ;;  %v1481_v61 = vpop.eup %1480 }
 0x20a   :  { %1484 = vtanh.f32 %v717_v63  ;;  %v767_v56 = vmul.f32 %v1481_v61, %v766_v4  ;;  %v1483_v21 = vpop.eup %1482  ;;  %v691_v63 = vperm.slane %v675_v47, 0  ;;  %v903_v61 = vrot.slane %v1862_v14, 1 }
 0x20b   :  { %v757_v12 = vadd.f32 %v755_v0, %v1991_v13  ;;  %1486 = vtanh.f32 %v719_v59  ;;  %v750_v32 = vmul.f32 %v1483_v21, %v748_v55  ;;  %v724_v59 = vadd.f32 %v692_v52, %v2022_v50 }
 0x20c   :  { %1488 = vtanh.f32 %v721_v33  ;;  %v904_v50 = vrot.slane %v1862_v14, 2  ;;  %v988_v47 = vstv %s2073_s22 }
 0x20d   :  { %v763_v58 = vadd.f32 %v761_v9, %v757_v12  ;;  %1436 = vset.pattern.permute.xlu1 %v1750_v15 }
 0x20e   :  { %1279 = vperm.xlu1 %1436, %v1438_v7   ;;  %v851_v11 = vpop.permute.xlu0 %850  ;;  %v2043_v30 = vpop.permute.xlu2 %801 }
 0x20f   :  { %v632_v25 = vpop.permute.xlu1 %631  ;;  %v2041_v27 = vadd.f32 %v767_v56, %v763_v58  ;;  %v784_v56 = vstv %s2058_s20  ;;  %v918_v58 = vperm.slane %v903_v61, 0 }
 0x210   :  { %v1485_v13 = vpop.eup %1484  ;;  %v720_v16 = vadd.f32 %v688_v17, %v632_v25  ;;  %v919_v25 = vperm.slane %v904_v50, 0 }
 0x211   :  { %v744_v31 = vmul.f32 %v1485_v13, %v742_v19  ;;  %v1487_v15 = vpop.eup %1486  ;;  %v682_v19 = vperm.slane %v667_v34, 0  ;;  %v950_v22 = vadd.f32 %v918_v58, %v2043_v30  ;;  %v917_v13 = vperm.slane %v1862_v14, 0 }
 0x212   :  { %1490 = vtanh.f32 %v720_v16  ;;  %v756_v5 = vmul.f32 %v1487_v15, %v754_v57  ;;  %v1489_v42 = vpop.eup %1488  ;;  %v911_v16 = vrot.slane %v1845_v60, 2  ;;  %v982_v30 = vstv %s2066_s21 }
 0x213   :  { %v746_v38 = vadd.f32 %v744_v31, %v548_v28  ;;  %1492 = vtanh.f32 %v722_v29  ;;  %v768_v48 = vmul.f32 %v1489_v42, %v766_v4 }
 0x214   :  { %1494 = vtanh.f32 %v715_v40  ;;  %v910_v40 = vrot.slane %v1845_v60, 1  ;;  %v927_v26 = vperm.slane %v911_v16, 0 }
 0x215   :  { %v752_v39 = vadd.f32 %v750_v32, %v746_v38 }
 0x216   :  { %v809_v41 = vpop.permute.xlu0 %808  ;;  %v865_v35 = vpop.permute.xlu2 %864 }
 0x217   :  { %v758_v44 = vadd.f32 %v756_v5, %v752_v39  ;;  %v590_v45 = vpop.permute.xlu1 %589  ;;  %v912_v5 = vrot.slane %v1845_v60, 3  ;;  %v959_v43 = vadd.f32 %v927_v26, %v865_v35  ;;  %v907_v35 = vrot.slane %v1862_v14, 5 }
 0x218   :  { %v1491_v18 = vpop.eup %1490  ;;  %v714_v55 = vadd.f32 %v682_v19, %v590_v45 }
 0x219   :  { %v762_v28 = vmul.f32 %v1491_v18, %v760_v36  ;;  %v1493_v46 = vpop.eup %1492  ;;  %v925_v36 = vperm.slane %v1845_v60, 0  ;;  %v926_v18 = vperm.slane %v910_v40, 0  ;;  %v1006_v40 = vstv %s2088_s24 }
 0x21a   :  { %1496 = vtanh.f32 %v714_v55  ;;  %v774_v57 = vmul.f32 %v1493_v46, %v772_v51  ;;  %v1495_v0 = vpop.eup %1494  ;;  %v906_v55 = vrot.slane %v1862_v14, 4 }
 0x21b   :  { %v764_v53 = vadd.f32 %v762_v28, %v758_v44  ;;  %1498 = vtanh.f32 %v716_v3  ;;  %v957_v4 = vadd.f32 %v925_v36, %v851_v11  ;;  %v779_v33 = vmul.f32 %v1495_v0, %v778_v8 }
 0x21c   :  { %1500 = vtanh.f32 %v724_v59  ;;  %v928_v44 = vperm.slane %v912_v5, 0  ;;  %v905_v36 = vrot.slane %v1862_v14, 3  ;;  %v921_v0 = vperm.slane %v906_v55, 0 }
 0x21d   :  { %v770_v1 = vadd.f32 %v768_v48, %v764_v53 }
 0x21e   :  { %v872_v20 = vpop.permute.xlu0 %871  ;;  %v823_v17 = vpop.permute.xlu2 %822 }
 0x21f   :  { %v653_v6 = vpop.permute.xlu1 %652  ;;  %v776_v7 = vadd.f32 %v774_v57, %v770_v1  ;;  %v960_v48 = vadd.f32 %v928_v44, %v872_v20  ;;  %v994_v1 = vstv %s2076_s3  ;;  %v908_v44 = vrot.slane %v1862_v14, 6 }
 0x220   :  { %v1497_v54 = vpop.eup %1496  ;;  %v723_v9 = vadd.f32 %v691_v63, %v653_v6 }
 0x221   :  { %v773_v10 = vmul.f32 %v1497_v54, %v772_v51  ;;  %v1499_v12 = vpop.eup %1498  ;;  %v922_v54 = vperm.slane %v907_v35, 0 }
 0x222   :  { %1502 = vtanh.f32 %v723_v9  ;;  %v785_v21 = vmul.f32 %v1499_v12, %v784_v56  ;;  %v1501_v29 = vpop.eup %1500  ;;  %v914_v9 = vrot.slane %v1845_v60, 5 }
 0x223   :  { %v775_v49 = vadd.f32 %v773_v10, %v2041_v27  ;;  %1504 = vtanh.f32 %v957_v4  ;;  %v951_v27 = vadd.f32 %v919_v25, %v809_v41  ;;  %v786_v39 = vmul.f32 %v1501_v29, %v784_v56 }
 0x224   :  { %1506 = vtanh.f32 %v950_v22  ;;  %v1000_v22 = vstv %s2083_s23 }
 0x225   :  { %v781_v11 = vadd.f32 %v779_v33, %v775_v49 }
 0x226   :  { %v830_v62 = vpop.permute.xlu0 %829  ;;  %v886_v45 = vpop.permute.xlu2 %885 }
 0x227   :  { %v795_v31 = vpop.permute.xlu1 %794  ;;  %v787_v15 = vadd.f32 %v785_v21, %v781_v11  ;;  %v954_v50 = vadd.f32 %v922_v54, %v830_v62  ;;  %v913_v11 = vrot.slane %v1845_v60, 4 }
 0x228   :  { %v1503_v34 = vpop.eup %1502  ;;  %v949_v32 = vadd.f32 %v917_v13, %v795_v31  ;;  %v930_v13 = vperm.slane %v914_v9, 0 }
 0x229   :  { %v780_v37 = vmul.f32 %v1503_v34, %v778_v8  ;;  %v1505_v38 = vpop.eup %1504  ;;  %v920_v8 = vperm.slane %v905_v36, 0 }
 0x22a   :  { %1508 = vtanh.f32 %v949_v32  ;;  %v984_v42 = vmul.f32 %v1505_v38, %v982_v30  ;;  %v1507_v3 = vpop.eup %1506 }
 0x22b   :  { %v782_v19 = vadd.f32 %v780_v37, %v776_v7  ;;  %1510 = vtanh.f32 %v951_v27  ;;  %v989_v63 = vmul.f32 %v1507_v3, %v988_v47  ;;  %v953_v7 = vadd.f32 %v921_v0, %v823_v17 }
 0x22c   :  { %1512 = vtanh.f32 %v959_v43  ;;  %v915_v17 = vrot.slane %v1845_v60, 6  ;;  %v929_v27 = vperm.slane %v913_v11, 0  ;;  %v909_v37 = vrot.slane %v1862_v14, 7 }
 0x22d   :  { %v788_v41 = vadd.f32 %v786_v39, %v782_v19  ;;  %v1012_v43 = vstv %s2091_s25  ;;  %v1150_v0 = vrot.slane %v1852_v2, 1 }
 0x22e   :  { %v893_v57 = vpop.permute.xlu0 %892  ;;  %v844_v33 = vpop.permute.xlu2 %843  ;;  %v931_v34 = vperm.slane %v915_v17, 0 }
 0x22f   :  { %v858_v28 = vpop.permute.xlu1 %857  ;;  %v986_v46 = vadd.f32 %v984_v42, %v788_v41 }
 0x230   :  { %v1509_v51 = vpop.eup %1508  ;;  %v958_v52 = vadd.f32 %v926_v18, %v858_v28  ;;  %v963_v39 = vadd.f32 %v931_v34, %v893_v57  ;;  %v924_v18 = vperm.slane %v909_v37, 0 }
 0x231   :  { %v983_v53 = vmul.f32 %v1509_v51, %v982_v30  ;;  %v1511_v59 = vpop.eup %1510 }
 0x232   :  { %1514 = vtanh.f32 %v958_v52  ;;  %v995_v6 = vmul.f32 %v1511_v59, %v994_v1  ;;  %v1513_v4 = vpop.eup %1512  ;;  %v956_v28 = vadd.f32 %v924_v18, %v844_v33  ;;  %v1228_v18 = vstv %s2113_s6 }
 0x233   :  { %v985_v61 = vadd.f32 %v983_v53, %v787_v15  ;;  %1516 = vtanh.f32 %v960_v48  ;;  %v996_v25 = vmul.f32 %v1513_v4, %v994_v1  ;;  %v962_v15 = vadd.f32 %v930_v13, %v886_v45 }
 0x234   :  { %1518 = vtanh.f32 %v953_v7  ;;  %v923_v48 = vperm.slane %v908_v44, 0  ;;  %v1165_v7 = vperm.slane %v1852_v2, 0  ;;  %v1222_v13 = vstv %s2105_s5 }
 0x235   :  { %v991_v20 = vadd.f32 %v989_v63, %v985_v61  ;;  %v1018_v63 = vstv %s2098_s26  ;;  %v916_v61 = vrot.slane %v1845_v60, 7 }
 0x236   :  { %v1035_v16 = vpop.permute.xlu0 %1034  ;;  %v1091_v41 = vpop.permute.xlu2 %1090 }
 0x237   :  { %v816_v10 = vpop.permute.xlu1 %815  ;;  %v997_v12 = vadd.f32 %v995_v6, %v991_v20  ;;  %v1197_v4 = vadd.f32 %v1165_v7, %v1091_v41 }
 0x238   :  { %v1515_v56 = vpop.eup %1514  ;;  %v952_v58 = vadd.f32 %v920_v8, %v816_v10  ;;  %v1166_v10 = vperm.slane %v1150_v0, 0 }
 0x239   :  { %v990_v49 = vmul.f32 %v1515_v56, %v988_v47  ;;  %v1517_v21 = vpop.eup %1516  ;;  %v1157_v47 = vperm.slane %v1870_v23, 0 }
 0x23a   :  { %1520 = vtanh.f32 %v952_v58  ;;  %v1002_v31 = vmul.f32 %v1517_v21, %v1000_v22  ;;  %v1519_v32 = vpop.eup %1518  ;;  %v1024_v21 = vstv %s2102_s27 }
 0x23b   :  { %v992_v29 = vadd.f32 %v990_v49, %v986_v46  ;;  %1522 = vtanh.f32 %v954_v50  ;;  %v1007_v45 = vmul.f32 %v1519_v32, %v1006_v40  ;;  %v1189_v1 = vadd.f32 %v1157_v47, %v1035_v16 }
 0x23c   :  { %1524 = vtanh.f32 %v962_v15  ;;  %v1144_v50 = vrot.slane %v1870_v23, 2  ;;  %v1143_v16 = vrot.slane %v1870_v23, 1 }
 0x23d   :  { %v998_v62 = vadd.f32 %v996_v25, %v992_v29  ;;  %v1145_v29 = vrot.slane %v1870_v23, 3 }
 0x23e   :  { %v1098_v51 = vpop.permute.xlu0 %1097  ;;  %v1049_v54 = vpop.permute.xlu2 %1048  ;;  %v1159_v15 = vperm.slane %v1144_v50, 0 }
 0x23f   :  { %v879_v38 = vpop.permute.xlu1 %878  ;;  %v1004_v30 = vadd.f32 %v1002_v31, %v998_v62 }
 0x240   :  { %v1521_v5 = vpop.eup %1520  ;;  %v961_v26 = vadd.f32 %v929_v27, %v879_v38  ;;  %v1191_v27 = vadd.f32 %v1159_v15, %v1049_v54  ;;  %v1160_v38 = vperm.slane %v1145_v29, 0  ;;  %v1240_v54 = vstv %s2121_s29 }
 0x241   :  { %v1001_v19 = vmul.f32 %v1521_v5, %v1000_v22  ;;  %v1523_v42 = vpop.eup %1522  ;;  %v1198_v22 = vadd.f32 %v1166_v10, %v1098_v51  ;;  %v1246_v15 = vstv %s2128_s30 }
 0x242   :  { %1526 = vtanh.f32 %v961_v26  ;;  %v1013_v55 = vmul.f32 %v1523_v42, %v1012_v43  ;;  %v1525_v52 = vpop.eup %1524 }
 0x243   :  { %v1003_v3 = vadd.f32 %v1001_v19, %v997_v12  ;;  %1528 = vtanh.f32 %v963_v39  ;;  %v1014_v6 = vmul.f32 %v1525_v52, %v1012_v43  ;;  %v932_v12 = vperm.slane %v916_v61, 0 }
 0x244   :  { %1530 = vtanh.f32 %v956_v28 }
 0x245   :  { %v1009_v46 = vadd.f32 %v1007_v45, %v1003_v3  ;;  %v1153_v3 = vrot.slane %v1852_v2, 4 }
 0x246   :  { %v1056_v33 = vpop.permute.xlu0 %1055  ;;  %v1112_v37 = vpop.permute.xlu2 %1111 }
 0x247   :  { %v837_v53 = vpop.permute.xlu1 %836  ;;  %v1015_v57 = vadd.f32 %v1013_v55, %v1009_v46  ;;  %v1192_v42 = vadd.f32 %v1160_v38, %v1056_v33  ;;  %v1151_v55 = vrot.slane %v1852_v2, 2 }
 0x248   :  { %v1527_v59 = vpop.eup %1526  ;;  %v955_v14 = vadd.f32 %v923_v48, %v837_v53  ;;  %v1169_v53 = vperm.slane %v1153_v3, 0 }
 0x249   :  { %v1008_v35 = vmul.f32 %v1527_v59, %v1006_v40  ;;  %v1529_v36 = vpop.eup %1528  ;;  %v1152_v40 = vrot.slane %v1852_v2, 3 }
 0x24a   :  { %1532 = vtanh.f32 %v955_v14  ;;  %v1020_v8 = vmul.f32 %v1529_v36, %v1018_v63  ;;  %v1531_v56 = vpop.eup %1530 }
 0x24b   :  { %v1010_v20 = vadd.f32 %v1008_v35, %v1004_v30  ;;  %1534 = vtanh.f32 %v1189_v1  ;;  %v1025_v31 = vmul.f32 %v1531_v56, %v1024_v21  ;;  %v1158_v30 = vperm.slane %v1143_v16, 0 }
 0x24c   :  { %1536 = vtanh.f32 %v1197_v4  ;;  %v1168_v46 = vperm.slane %v1152_v40, 0  ;;  %v1147_v1 = vrot.slane %v1870_v23, 5  ;;  %v1146_v4 = vrot.slane %v1870_v23, 4 }
 0x24d   :  { %v1016_v9 = vadd.f32 %v1014_v6, %v1010_v20 }
 0x24e   :  { %v1119_v44 = vpop.permute.xlu0 %1118  ;;  %v1200_v48 = vadd.f32 %v1168_v46, %v1112_v37  ;;  %v1070_v0 = vpop.permute.xlu2 %1069  ;;  %v1162_v10 = vperm.slane %v1147_v1, 0  ;;  %v1258_v46 = vstv %s2138_s11 }
 0x24f   :  { %v900_v58 = vpop.permute.xlu1 %899  ;;  %v1022_v49 = vadd.f32 %v1020_v8, %v1016_v9  ;;  %v1201_v61 = vadd.f32 %v1169_v53, %v1119_v44  ;;  %v1148_v8 = vrot.slane %v1870_v23, 6 }
 0x250   :  { %v1533_v60 = vpop.eup %1532  ;;  %v964_v17 = vadd.f32 %v932_v12, %v900_v58  ;;  %v1194_v33 = vadd.f32 %v1162_v10, %v1070_v0  ;;  %v1264_v0 = vstv %s1418_s12 }
 0x251   :  { %v1019_v11 = vmul.f32 %v1533_v60, %v1018_v63  ;;  %v1535_v25 = vpop.eup %1534  ;;  %v1234_v63 = vstv %s2118_s28  ;;  %v1161_v60 = vperm.slane %v1146_v4, 0 }
 0x252   :  { %1538 = vtanh.f32 %v964_v17  ;;  %v1223_v34 = vmul.f32 %v1535_v25, %v1222_v13  ;;  %v1537_v5 = vpop.eup %1536 }
 0x253   :  { %v1021_v62 = vadd.f32 %v1019_v11, %v1015_v57  ;;  %1540 = vtanh.f32 %v1198_v22  ;;  %v1224_v28 = vmul.f32 %v1537_v5, %v1222_v13  ;;  %v1167_v57 = vperm.slane %v1151_v55, 0 }
 0x254   :  { %1542 = vtanh.f32 %v1191_v27  ;;  %v1155_v22 = vrot.slane %v1852_v2, 6  ;;  %v1154_v27 = vrot.slane %v1852_v2, 5 }
 0x255   :  { %v1027_v32 = vadd.f32 %v1025_v31, %v1021_v62 }
 0x256   :  { %v1077_v56 = vpop.permute.xlu0 %1076  ;;  %v1133_v62 = vpop.permute.xlu2 %1132  ;;  %v1171_v37 = vperm.slane %v1155_v22, 0 }
 0x257   :  { %v1042_v39 = vpop.permute.xlu1 %1041  ;;  %v1225_v26 = vadd.f32 %v1223_v34, %v1027_v32  ;;  %v1156_v34 = vrot.slane %v1852_v2, 7 }
 0x258   :  { %v1539_v19 = vpop.eup %1538  ;;  %v1190_v43 = vadd.f32 %v1158_v30, %v1042_v39  ;;  %v1203_v5 = vadd.f32 %v1171_v37, %v1133_v62 }
 0x259   :  { %v1026_v41 = vmul.f32 %v1539_v19, %v1024_v21  ;;  %v1541_v45 = vpop.eup %1540  ;;  %v1170_v19 = vperm.slane %v1154_v27, 0  ;;  %v1310_v27 = vld [vmem:[#allocation8 + $0x8] sm:$0xff] }
 0x25a   :  { %1544 = vtanh.f32 %v1190_v43  ;;  %v1230_v47 = vmul.f32 %v1541_v45, %v1228_v18  ;;  %v1543_v59 = vpop.eup %1542  ;;  %v1252_v45 = vstv %s2133_s8  ;;  %v1314_v37 = vpack.c.bf16 %v1310_v27, %v1310_v27 }
 0x25b   :  { %v1028_v51 = vadd.f32 %v1026_v41, %v1022_v49  ;;  %1546 = vtanh.f32 %v1192_v42  ;;  %v1235_v9 = vmul.f32 %v1543_v59, %v1234_v63  ;;  %v1163_v49 = vperm.slane %v1148_v8, 0 }
 0x25c   :  { %1548 = vtanh.f32 %v1200_v48 }
 0x25d   :  { %v1226_v52 = vadd.f32 %v1224_v28, %v1028_v51  ;;  %v1195_v13 = vadd.f32 %v1163_v49, %v1077_v56  ;;  %v1149_v28 = vrot.slane %v1870_v23, 7  ;;  %v1270_v23 = vand.u32 127, %v310_v24 }
 0x25e   :  { %v1140_v40 = vpop.permute.xlu0 %1139 }
 0x25f   :  { %v1105_v14 = vpop.permute.xlu1 %1104  ;;  %v1232_v35 = vadd.f32 %v1230_v47, %v1226_v52  ;;  %v1164_v53 = vperm.slane %v1149_v28, 0 }
 0x260   :  { %v1545_v36 = vpop.eup %1544  ;;  %v1199_v6 = vadd.f32 %v1167_v57, %v1105_v14 }
 0x261   :  { %v1229_v7 = vmul.f32 %v1545_v36, %v1228_v18  ;;  %v1547_v20 = vpop.eup %1546 }
 0x262   :  { %1550 = vtanh.f32 %v1199_v6  ;;  %v1241_v50 = vmul.f32 %v1547_v20, %v1240_v54  ;;  %v1549_v21 = vpop.eup %1548 }
 0x263   :  { %v1231_v12 = vadd.f32 %v1229_v7, %v1225_v26  ;;  %1552 = vtanh.f32 %v1201_v61  ;;  %v1242_v32 = vmul.f32 %v1549_v21, %v1240_v54  ;;  %v1172_v26 = vperm.slane %v1156_v34, 0  ;;  %v1277_v54 = vpop.permute.xlu2 %1276  ;;  %v1309_v34 = vld [vmem:[#allocation8] sm:$0xff] }
 0x264   :  { %1554 = vtanh.f32 %v1194_v33  ;;  %vm1281_vm3 = vcmp.lt.s32.totalorder %v1270_v23, %v1277_v54 }
 0x265   :  { %v1237_v58 = vadd.f32 %v1235_v9, %v1231_v12  ;;  %v1204_v2 = vadd.f32 %v1172_v26, %v1140_v40  ;;  %v1320_v40 = vunpack.c.l.b16 %v1314_v37 }
 0x267   :  { %v1063_v17 = vpop.permute.xlu1 %1062  ;;  %v1243_v11 = vadd.f32 %v1241_v50, %v1237_v58 }
 0x268   :  { %v1551_v25 = vpop.eup %1550  ;;  %v1193_v29 = vadd.f32 %v1161_v60, %v1063_v17 }
 0x269   :  { %v1236_v16 = vmul.f32 %v1551_v25, %v1234_v63  ;;  %v1553_v31 = vpop.eup %1552 }
 0x26a   :  { %1556 = vtanh.f32 %v1193_v29  ;;  %v1248_v30 = vmul.f32 %v1553_v31, %v1246_v15  ;;  %v1555_v42 = vpop.eup %1554  ;;  %v1312_v31 = vld [vmem:[#allocation8 + $0x18] sm:$0xff] }
 0x26b   :  { %v1238_v38 = vadd.f32 %v1236_v16, %v1232_v35  ;;  %1558 = vtanh.f32 %v1195_v13  ;;  %v1253_v51 = vmul.f32 %v1555_v42, %v1252_v45  ;;  %v1311_v16 = vld [vmem:[#allocation8 + $0x10] sm:$0xff]  ;;  %v1316_v62 = vpack.c.bf16 %v1312_v31, %v1312_v31 }
 0x26c   :  { %1560 = vtanh.f32 %v1203_v5 }
 0x26d   :  { %v1244_v39 = vadd.f32 %v1242_v32, %v1238_v38  ;;  %v1313_v32 = vpack.c.bf16 %v1309_v34, %v1309_v34 }
 0x26f   :  { %v1126_v43 = vpop.permute.xlu1 %1125  ;;  %v1250_v41 = vadd.f32 %v1248_v30, %v1244_v39  ;;  %v1342_v30 = vunpack.c.l.b16 %v1316_v62  ;;  %v1319_v5 = vunpack.c.l.b16 %v1313_v32 }
 0x270   :  { %v1557_v44 = vpop.eup %1556  ;;  %v1202_v18 = vadd.f32 %v1170_v19, %v1126_v43 }
 0x271   :  { %v1247_v3 = vmul.f32 %v1557_v44, %v1246_v15  ;;  %v1559_v55 = vpop.eup %1558  ;;  %v1315_v15 = vpack.c.bf16 %v1311_v16, %v1311_v16  ;;  %v1321_v26 = vpack.c.b16 %v1320_v40, %v1319_v5 }
 0x272   :  { %1562 = vtanh.f32 %v1202_v18  ;;  %v1259_v52 = vmul.f32 %v1559_v55, %v1258_v46  ;;  %v1561_v57 = vpop.eup %1560 }
 0x273   :  { %v1249_v47 = vadd.f32 %v1247_v3, %v1243_v11  ;;  %1564 = vtanh.f32 %v1204_v2  ;;  %v1260_v6 = vmul.f32 %v1561_v57, %v1258_v46  ;;  %v1341_v38 = vunpack.c.l.b16 %v1315_v15  ;;  %1333 = vmatpush.bf16.msra.mxu2 %v1321_v26 }
 0x275   :  { %v1255_v48 = vadd.f32 %v1253_v51, %v1249_v47  ;;  %v1343_v39 = vpack.c.b16 %v1342_v30, %v1341_v38 }
 0x277   :  { %v1084_v59 = vpop.permute.xlu1 %1083  ;;  %v1261_v1 = vadd.f32 %v1259_v52, %v1255_v48  ;;  %1355 = vmatpush.bf16.msra.mxu3 %v1343_v39 }
 0x278   :  { %v1563_v14 = vpop.eup %1562  ;;  %v1196_v35 = vadd.f32 %v1164_v53, %v1084_v59 }
 0x279   :  { %v1254_v36 = vmul.f32 %v1563_v14, %v1252_v45  ;;  %v1565_v63 = vpop.eup %1564 }
 0x27a   :  { %1566 = vtanh.f32 %v1196_v35  ;;  %v1266_v20 = vmul.f32 %v1565_v63, %v1264_v0 }
 0x27b   :  { %v1256_v61 = vadd.f32 %v1254_v36, %v1250_v41 }
 0x27d   :  { %v1262_v7 = vadd.f32 %v1260_v6, %v1256_v61 }
 0x27f   :  { %v1268_v8 = vadd.f32 %v1266_v20, %v1262_v7 }
 0x280   :  { %v1567_v4 = vpop.eup %1566  ;;  %v1280_v9 = vpop.permute.xlu1 %1279 }
 0x281   :  { %vm1282_vm2 = vcmp.lt.s32.totalorder %v1270_v23, %v1280_v9  ;;  %v1265_v10 = vmul.f32 %v1567_v4, %v1264_v0 }
 0x282   :  { %v1284_v12 = vsel %vm1282_vm2, %v1268_v8, -1000000.0 }
 0x283   :  { %v1288_v56 = vsel %vm155_vm0, %v1284_v12, -inf  ;;  %v1267_v50 = vadd.f32 %v1265_v10, %v1261_v1 }
 0x284   :  { %1289 = vmax.xlane.f32.xlu2 %v1288_v56 }
 0x285   :  { %v1283_v33 = vsel %vm1281_vm3, %v1267_v50, -1000000.0 }
 0x286   :  { %v1285_v58 = vsel %vm155_vm0, %v1283_v33, -inf }
 0x287   :  { %1286 = vmax.xlane.f32.xlu0 %v1285_v58 }
 0x2f7   :  { %v1290_v49 = vpop.xlane.xlu2 %1289 }
 0x2f8   :  { %v1292_v24 = vsub.f32 %v1284_v12, %v1290_v49 }
 0x2fa   :  { %v1295_v60 = vmul.f32 1.442695, %v1292_v24  ;;  %v1287_v21 = vpop.xlane.xlu0 %1286 }
 0x2fb   :  { %v1291_v22 = vsub.f32 %v1283_v33, %v1287_v21 }
 0x2fc   :  { %1568 = vpow2.f32 %v1295_v60 }
 0x2fd   :  { %v1293_v17 = vmul.f32 1.442695, %v1291_v22 }
 0x2ff   :  { %1570 = vpow2.f32 %v1293_v17 }
 0x302   :  { %v1569_v11 = vpop.eup %1568 }
 0x303   :  { %v1300_v25 = vsel %vm155_vm0, %v1569_v11, 0.0 }
 0x304   :  { %1301 = vadd.xlane.f32.xlu0 %v1300_v25 }
 0x305   :  { %v1571_v13 = vpop.eup %1570 }
 0x306   :  { %v1297_v29 = vsel %vm155_vm0, %v1571_v13, 0.0 }
 0x307   :  { %1298 = vadd.xlane.f32.xlu1 %v1297_v29 }
 0x377   :  { %v1302_v19 = vpop.xlane.xlu0 %1301 }
 0x378   :  { %1572 = vrcp.f32 %v1302_v19 }
 0x37a   :  { %v1299_v42 = vpop.xlane.xlu1 %1298 }
 0x37b   :  { %1574 = vrcp.f32 %v1299_v42 }
 0x37e   :  { %v1573_v43 = vpop.eup %1572 }
 0x37f   :  { %v1306_v41 = vmul.f32 %v1573_v43, %v1569_v11 }
 0x381   :  { %v1575_v44 = vpop.eup %1574  ;;  %v1308_v45 = vpack.c.bf16 %v1306_v41, %v1306_v41 }
 0x382   :  { %v1305_v2 = vmul.f32 %v1575_v44, %v1571_v13 }
 0x383   :  { %1420 = vmatmul.msk.bf16.vlgmr.msra.gmra.mxu3 %vm155_vm0, %v1308_v45 }
 0x384   :  { %v1307_v18 = vpack.c.bf16 %v1305_v2, %v1305_v2 }
 0x386   :  { %1419 = vmatmul.msk.bf16.vlgmr.msra.gmra.mxu2 %vm155_vm0, %v1307_v18 }
 0x406   :  { %v1357_v3 = vpop.f32.mrf.mxu3 }
 0x407   :  { %1362 = vst.msk [vmem:[#allocation13 + $0x8] sm:$0xff] %vm128_vm1, %v1357_v3 }
 0x409   :  { %v1335_v55 = vpop.f32.mrf.mxu2 }
 0x40a   :  { %1361 = vst.msk [vmem:[#allocation13] sm:$0xff] %vm128_vm1, %v1335_v55 }
 0x40b   :  { %1375 = dma.vmem_to_hbm [thread:$0]  %s1368_s14, 256, %s1370_s15, [#allocation4], %s1743_s9, %s1743_s9, %s1744_s10  }
 0x40e   :  { %v1359_v28 = vpop.f32.mrf.mxu3 }
 0x411   :  { %v1337_v46 = vpop.f32.mrf.mxu2 }
 0x412   :  { %1740 = dma.done.wait [#allocation4], 256  }
 0x413   :  { %1741 = vsyncadd [#allocation4], 4294967040 }
 0x414   :  { %1380 = vsyncpa [#allocation3], 1 }
 0x415   :  { %1381 = vsyncpa [#allocation7], 1 }
 0x416   :  { %1382 = vsyncpa [#allocation10], 1 }
 0x417   :  { %1383 = vsyncpa [#allocation4], 1 }
 0x418   :  { %1384 = vsyncpa [#allocation5], 1 }

</bundles_post_ra>
